<compile_context>
chip_gen: v7x
topology: tpu7x:2x2x1
jax: 0.10.0
libtpu: 0.0.40
codegen_flags: <defaults>
</compile_context>

<pallas_src>
import jax
import jax.numpy as jnp
import numpy as np
from jax.experimental import pallas as pl
from jax.experimental.pallas import tpu as pltpu


_TAPS = tuple((dy, dx) for dy in (-1, 0, 1) for dx in (-1, 0, 1))


def _make_dcb_kernel(H, W, group):
    Ho, Wo = H // 2, W // 2
    gl_in = group * H * W
    gl_out = group * Ho * Wo

    def kernel(x_ref, w1_ref, w2_ref, sel_ref, o_ref):
        # x_ref  : (Cpad, NS)        channels-first activations, batch folded into lanes
        # w1_ref : (9, OF, Cpad)     conv1 weights, one (OF, Cpad) tile per 3x3 tap
        # w2_ref : (9, OF, OF)       conv2 weights
        # sel_ref: (gl_in, gl_out)   static one-hot 2x2-maxpool gather (per image group)
        # o_ref  : (OF, NB*Ho*Wo)    pooled output, lane-dense
        _, ns = x_ref.shape

        # Per-lane (y, x) coordinates (periodic over the folded batch), computed once.
        lane = jax.lax.broadcasted_iota(jnp.int32, (1, ns), 1)
        if (W & (W - 1)) == 0:
            xi = lane & (W - 1)
            row = lane >> (W.bit_length() - 1)
        else:
            xi = lane % W
            row = lane // W
        yi = (row & (H - 1)) if (H & (H - 1)) == 0 else (row % H)

        # Boundary-validity masks for the 8 off-centre taps, built ONCE and reused by
        # both convolutions (conv padding=1 == zero the lanes that wrapped around).
        masks = {}
        for dy, dx in _TAPS:
            conds = []
            if dy < 0:
                conds.append(yi >= -dy)
            if dy > 0:
                conds.append(yi < H - dy)
            if dx < 0:
                conds.append(xi >= -dx)
            if dx > 0:
                conds.append(xi < W - dx)
            valid = None
            for c in conds:
                valid = c if valid is None else (valid & c)
            masks[(dy, dx)] = valid

        def shift(a, delta):
            # b[:, s] = a[:, (s + delta) % ns]  -> roll by -delta (XLU rotate; no
            # slice+concat relayout copies).
            if delta % ns == 0:
                return a
            return pltpu.roll(a, shift=(-delta) % ns, axis=1)

        def conv3x3(a, w_ref):
            # Per-tap accumulation: 9 small MXU pushes, no (9*C, NS) patch matrix and
            # no sublane-misaligned concatenates.
            acc = None
            for t, (dy, dx) in enumerate(_TAPS):
                s = shift(a, dy * W + dx)
                valid = masks[(dy, dx)]
                if valid is not None:
                    s = jnp.where(valid, s, 0.0)
                contrib = jnp.dot(w_ref[t], s, preferred_element_type=jnp.float32)
                acc = contrib if acc is None else acc + contrib
            return acc

        x = x_ref[...].astype(jnp.float32)
        h1 = jnp.maximum(conv3x3(x, w1_ref), 0.0)      # conv1 + ReLU, (OF, NS)
        h2 = jnp.maximum(conv3x3(h1, w2_ref), 0.0)     # conv2 + ReLU, (OF, NS)

        # MaxPool2d(2, 2): shifted maxima put every 2x2-window max at its (even y,
        # even x) lane; the wrapper-built one-hot selector compacts those lanes via
        # an MXU gather with strictly-f32 operands.  Applied per image group so the
        # selector size / FLOPs stay linear in the batch and every output store is
        # a 128-lane-dense slice.
        m = jnp.maximum(h2, shift(h2, 1))
        m = jnp.maximum(m, shift(m, W))
        sel = sel_ref[...]
        for g in range(ns // gl_in):
            pooled = jnp.dot(m[:, g * gl_in:(g + 1) * gl_in], sel,
                             preferred_element_type=jnp.float32)
            o_ref[:, g * gl_out:(g + 1) * gl_out] = pooled.astype(o_ref.dtype)

    return kernel


def dcb_old_forward(x_nchw, w1, w2, *, batch_block=None):
    """x: (N, IF, H, W); w1: (OF, IF, 3, 3); w2: (OF, OF, 3, 3) -> (N, OF, H//2, W//2)."""
    N, Cin, H, W = x_nchw.shape
    OF = w1.shape[0]
    assert H % 2 == 0 and W % 2 == 0
    Ho, Wo = H // 2, W // 2

    # Grid-step sizing: >=2 steps when the batch allows (v7x megacore sharding +
    # pipeline overlap), capped so per-step lanes stay well inside v5e's 16 MiB
    # scoped-VMEM default; fall back to one step if splitting would leave a
    # non-128-multiple (masked-store) output block.
    if batch_block is None:
        batch_block = N
        if N >= 4 and N % 2 == 0:
            batch_block = N // 2
        max_lanes = 8192
        while batch_block % 2 == 0 and batch_block * H * W > max_lanes:
            batch_block //= 2
    assert N % batch_block == 0
    if N // batch_block > 1 and (
            (batch_block * Ho * Wo) % 128 != 0 or (batch_block * H * W) % 128 != 0):
        batch_block = N
    num_blocks = N // batch_block
    nsb = batch_block * H * W
    npo = batch_block * Ho * Wo

    # Tiny (KB-scale) layout plumbing: channels-first flattened activations and
    # per-tap 2-D weight tiles with the contraction dim padded to 8 sublanes.
    Cpad = -(-Cin // 8) * 8
    x_cf = jnp.transpose(x_nchw, (1, 0, 2, 3)).reshape(Cin, N * H * W)
    if Cpad != Cin:
        x_cf = jnp.pad(x_cf, ((0, Cpad - Cin), (0, 0)))
    w1_taps = jnp.transpose(w1, (2, 3, 0, 1)).reshape(9, OF, Cin)
    if Cpad != Cin:
        w1_taps = jnp.pad(w1_taps, ((0, 0), (0, 0), (0, Cpad - Cin)))
    w2_taps = jnp.transpose(w2, (2, 3, 0, 1)).reshape(9, OF, OF)

    # Static 2x2 max-pool selector, built host-side (never constructed in-kernel).
    # One selector per image *pair* (single image only if batch_block is odd), so
    # it never grows with batch_block: output j = n*Ho*Wo + yo*Wo + xo picks source
    # lane s = 4*j - 2*(j % Wo).
    group = 2 if batch_block % 2 == 0 else 1
    gl_in, gl_out = group * H * W, group * Ho * Wo
    j = np.arange(gl_out)
    src = 4 * j - 2 * (j % Wo)
    sel_np = np.zeros((gl_in, gl_out), np.float32)
    sel_np[src, j] = 1.0
    sel = jnp.asarray(sel_np)

    out2d = pl.pallas_call(
        _make_dcb_kernel(H, W, group),
        out_shape=jax.ShapeDtypeStruct((OF, N * Ho * Wo), x_nchw.dtype),
        grid=(num_blocks,),
        in_specs=[
            pl.BlockSpec((Cpad, nsb), lambda b: (0, b)),
            pl.BlockSpec((9, OF, Cpad), lambda b: (0, 0, 0)),
            pl.BlockSpec((9, OF, OF), lambda b: (0, 0, 0)),
            pl.BlockSpec((gl_in, gl_out), lambda b: (0, 0)),
        ],
        out_specs=pl.BlockSpec((OF, npo), lambda b: (0, b)),
        compiler_params=pltpu.CompilerParams(
            dimension_semantics=("parallel",)),
    )(x_cf, w1_taps, w2_taps, sel)

    return jnp.transpose(out2d.reshape(OF, N, Ho, Wo), (1, 0, 2, 3))


def _ref_forward(x_nchw, w1, w2, *, demote_operands_to_bf16=False):
    """Pure-JAX reference matching the PyTorch module semantics."""
    dn = ("NCHW", "OIHW", "NCHW")
    prec = jax.lax.Precision.HIGHEST

    def conv(a, w):
        if demote_operands_to_bf16:
            a = a.astype(jnp.bfloat16).astype(jnp.float32)
            w = w.astype(jnp.bfloat16).astype(jnp.float32)
        return jax.lax.conv_general_dilated(a, w, (1, 1), ((1, 1), (1, 1)),
                                            dimension_numbers=dn, precision=prec)

    y = jnp.maximum(conv(x_nchw, w1), 0.0)
    y = jnp.maximum(conv(y, w2), 0.0)
    return jax.lax.reduce_window(y, -jnp.inf, jax.lax.max,
                                 (1, 1, 2, 2), (1, 1, 2, 2), "VALID")


if __name__ == "__main__":
    # Small shapes consistent with the module: batch=2, IF=4, OF=8, spatial=16.
    N, IF, OF, H, W = 2, 4, 8, 16, 16
    key = jax.random.PRNGKey(0)
    kx, k1, k2 = jax.random.split(key, 3)
    x = jax.random.normal(kx, (N, IF, H, W), jnp.float32)
    w1 = jax.random.normal(k1, (OF, IF, 3, 3), jnp.float32) * 0.1
    w2 = jax.random.normal(k2, (OF, OF, 3, 3), jnp.float32) * 0.1

    out = jax.block_until_ready(jax.jit(dcb_old_forward)(x, w1, w2))
    assert out.shape == (N, OF, H // 2, W // 2), out.shape

    # Tight check against a full-f32 reference (accumulation-order noise only);
    # fall back to a bf16-operand reference in case this backend lowers f32 MXU
    # matmuls at DEFAULT (bf16-pass) precision.
    ref_f32 = _ref_forward(x, w1, w2)
    ok = jnp.allclose(out, ref_f32, atol=1e-4, rtol=1e-4)
    if not ok:
        ref_bf16 = _ref_forward(x, w1, w2, demote_operands_to_bf16=True)
        ok = jnp.allclose(out, ref_bf16, atol=5e-3, rtol=1e-2)
    if not ok:
        err = float(jnp.max(jnp.abs(out - ref_f32)))
        raise AssertionError(f"Pallas DCB_Old output mismatch (max abs err {err:.3e})")
    print("KERNEL_OK")
</pallas_src>

<mosaic_0001>
module attributes {stable_mosaic.version = 11 : i64} {
  func.func @kernel(%arg0: i32, %arg1: memref<8x512xf32, #tpu.memory_space<vmem>>, %arg2: memref<9x8x8xf32, #tpu.memory_space<vmem>>, %arg3: memref<9x8x8xf32, #tpu.memory_space<vmem>>, %arg4: memref<512x128xf32, #tpu.memory_space<vmem>>, %arg5: memref<8x128xf32, #tpu.memory_space<vmem>>) attributes {dimension_semantics = [#tpu.dimension_semantics<parallel>], iteration_bounds = array<i64: 1>, scalar_prefetch = 0 : i64, scratch_operands = 0 : i64, tpu.core_type = #tpu.core_type<tc>, window_params = [{transform_indices = @transform_0, window_bounds = array<i64: 8, 512>}, {pipeline_mode = #tpu.pipeline_mode<synchronous>, transform_indices = @transform_1, window_bounds = array<i64: 9, 8, 8>}, {pipeline_mode = #tpu.pipeline_mode<synchronous>, transform_indices = @transform_2, window_bounds = array<i64: 9, 8, 8>}, {pipeline_mode = #tpu.pipeline_mode<synchronous>, transform_indices = @transform_3, window_bounds = array<i64: 512, 128>}, {transform_indices = @transform_4, window_bounds = array<i64: 8, 128>}]} {
    %0 = tpu.iota {dimensions = array<i32: 1>} : vector<1x512xi32>
    %c15_i32 = arith.constant 15 : i32
    %1 = vector.broadcast %c15_i32 : i32 to vector<1x512xi32>
    %2 = arith.andi %0, %1 : vector<1x512xi32>
    %c4_i32 = arith.constant 4 : i32
    %3 = vector.broadcast %c4_i32 : i32 to vector<1x512xi32>
    %4 = arith.shrsi %0, %3 : vector<1x512xi32>
    %c15_i32_0 = arith.constant 15 : i32
    %5 = vector.broadcast %c15_i32_0 : i32 to vector<1x512xi32>
    %6 = arith.andi %4, %5 : vector<1x512xi32>
    %c1_i32 = arith.constant 1 : i32
    %7 = vector.broadcast %c1_i32 : i32 to vector<1x512xi32>
    %8 = arith.cmpi sge, %6, %7 : vector<1x512xi32>
    %c1_i32_1 = arith.constant 1 : i32
    %9 = vector.broadcast %c1_i32_1 : i32 to vector<1x512xi32>
    %10 = arith.cmpi sge, %2, %9 : vector<1x512xi32>
    %11 = arith.andi %8, %10 : vector<1x512xi1>
    %c1_i32_2 = arith.constant 1 : i32
    %12 = vector.broadcast %c1_i32_2 : i32 to vector<1x512xi32>
    %13 = arith.cmpi sge, %6, %12 : vector<1x512xi32>
    %c1_i32_3 = arith.constant 1 : i32
    %14 = vector.broadcast %c1_i32_3 : i32 to vector<1x512xi32>
    %15 = arith.cmpi sge, %6, %14 : vector<1x512xi32>
    %c15_i32_4 = arith.constant 15 : i32
    %16 = vector.broadcast %c15_i32_4 : i32 to vector<1x512xi32>
    %17 = arith.cmpi slt, %2, %16 : vector<1x512xi32>
    %18 = arith.andi %15, %17 : vector<1x512xi1>
    %c1_i32_5 = arith.constant 1 : i32
    %19 = vector.broadcast %c1_i32_5 : i32 to vector<1x512xi32>
    %20 = arith.cmpi sge, %2, %19 : vector<1x512xi32>
    %c15_i32_6 = arith.constant 15 : i32
    %21 = vector.broadcast %c15_i32_6 : i32 to vector<1x512xi32>
    %22 = arith.cmpi slt, %2, %21 : vector<1x512xi32>
    %c15_i32_7 = arith.constant 15 : i32
    %23 = vector.broadcast %c15_i32_7 : i32 to vector<1x512xi32>
    %24 = arith.cmpi slt, %6, %23 : vector<1x512xi32>
    %c1_i32_8 = arith.constant 1 : i32
    %25 = vector.broadcast %c1_i32_8 : i32 to vector<1x512xi32>
    %26 = arith.cmpi sge, %2, %25 : vector<1x512xi32>
    %27 = arith.andi %24, %26 : vector<1x512xi1>
    %c15_i32_9 = arith.constant 15 : i32
    %28 = vector.broadcast %c15_i32_9 : i32 to vector<1x512xi32>
    %29 = arith.cmpi slt, %6, %28 : vector<1x512xi32>
    %c15_i32_10 = arith.constant 15 : i32
    %30 = vector.broadcast %c15_i32_10 : i32 to vector<1x512xi32>
    %31 = arith.cmpi slt, %6, %30 : vector<1x512xi32>
    %c15_i32_11 = arith.constant 15 : i32
    %32 = vector.broadcast %c15_i32_11 : i32 to vector<1x512xi32>
    %33 = arith.cmpi slt, %2, %32 : vector<1x512xi32>
    %34 = arith.andi %31, %33 : vector<1x512xi1>
    %c0 = arith.constant 0 : index
    %c0_12 = arith.constant 0 : index
    %35 = vector.load %arg1[%c0, %c0_12] : memref<8x512xf32, #tpu.memory_space<vmem>>, vector<8x512xf32>
    %c17_i32 = arith.constant 17 : i32
    %36 = tpu.dynamic_rotate %35 by %c17_i32 dim 1 : vector<8x512xf32>, i32 -> vector<8x512xf32>
    %cst = arith.constant 0.000000e+00 : f32
    %37 = vector.shape_cast %11 : vector<1x512xi1> to vector<1x512xi1>
    %38 = vector.broadcast %37 : vector<1x512xi1> to vector<8x512xi1>
    %39 = vector.broadcast %cst : f32 to vector<8x512xf32>
    %40 = arith.select %38, %36, %39 : vector<8x512xi1>, vector<8x512xf32>
    %c0_13 = arith.constant 0 : index
    %c0_14 = arith.constant 0 : index
    %c0_15 = arith.constant 0 : index
    %41 = vector.load %arg2[%c0_13, %c0_14, %c0_15] : memref<9x8x8xf32, #tpu.memory_space<vmem>>, vector<1x8x8xf32>
    %42 = vector.shape_cast %41 : vector<1x8x8xf32> to vector<8x8xf32>
    %cst_16 = arith.constant dense<0.000000e+00> : vector<8x512xf32>
    %43 = tpu.matmul %42, %40, %cst_16 {dimension_numbers = #tpu.dot_dimension_numbers<[1], [0], [0], [1], [0, 0, 1, 1], [], []>} : vector<8x8xf32>, vector<8x512xf32>, vector<8x512xf32> -> vector<8x512xf32>
    %c16_i32 = arith.constant 16 : i32
    %44 = tpu.dynamic_rotate %35 by %c16_i32 dim 1 : vector<8x512xf32>, i32 -> vector<8x512xf32>
    %cst_17 = arith.constant 0.000000e+00 : f32
    %45 = vector.shape_cast %13 : vector<1x512xi1> to vector<1x512xi1>
    %46 = vector.broadcast %45 : vector<1x512xi1> to vector<8x512xi1>
    %47 = vector.broadcast %cst_17 : f32 to vector<8x512xf32>
    %48 = arith.select %46, %44, %47 : vector<8x512xi1>, vector<8x512xf32>
    %c1 = arith.constant 1 : index
    %c0_18 = arith.constant 0 : index
    %c0_19 = arith.constant 0 : index
    %49 = vector.load %arg2[%c1, %c0_18, %c0_19] : memref<9x8x8xf32, #tpu.memory_space<vmem>>, vector<1x8x8xf32>
    %50 = vector.shape_cast %49 : vector<1x8x8xf32> to vector<8x8xf32>
    %cst_20 = arith.constant dense<0.000000e+00> : vector<8x512xf32>
    %51 = tpu.matmul %50, %48, %cst_20 {dimension_numbers = #tpu.dot_dimension_numbers<[1], [0], [0], [1], [0, 0, 1, 1], [], []>} : vector<8x8xf32>, vector<8x512xf32>, vector<8x512xf32> -> vector<8x512xf32>
    %52 = arith.addf %43, %51 : vector<8x512xf32>
    %c15_i32_21 = arith.constant 15 : i32
    %53 = tpu.dynamic_rotate %35 by %c15_i32_21 dim 1 : vector<8x512xf32>, i32 -> vector<8x512xf32>
    %cst_22 = arith.constant 0.000000e+00 : f32
    %54 = vector.shape_cast %18 : vector<1x512xi1> to vector<1x512xi1>
    %55 = vector.broadcast %54 : vector<1x512xi1> to vector<8x512xi1>
    %56 = vector.broadcast %cst_22 : f32 to vector<8x512xf32>
    %57 = arith.select %55, %53, %56 : vector<8x512xi1>, vector<8x512xf32>
    %c2 = arith.constant 2 : index
    %c0_23 = arith.constant 0 : index
    %c0_24 = arith.constant 0 : index
    %58 = vector.load %arg2[%c2, %c0_23, %c0_24] : memref<9x8x8xf32, #tpu.memory_space<vmem>>, vector<1x8x8xf32>
    %59 = vector.shape_cast %58 : vector<1x8x8xf32> to vector<8x8xf32>
    %cst_25 = arith.constant dense<0.000000e+00> : vector<8x512xf32>
    %60 = tpu.matmul %59, %57, %cst_25 {dimension_numbers = #tpu.dot_dimension_numbers<[1], [0], [0], [1], [0, 0, 1, 1], [], []>} : vector<8x8xf32>, vector<8x512xf32>, vector<8x512xf32> -> vector<8x512xf32>
    %61 = arith.addf %52, %60 : vector<8x512xf32>
    %c1_i32_26 = arith.constant 1 : i32
    %62 = tpu.dynamic_rotate %35 by %c1_i32_26 dim 1 : vector<8x512xf32>, i32 -> vector<8x512xf32>
    %cst_27 = arith.constant 0.000000e+00 : f32
    %63 = vector.shape_cast %20 : vector<1x512xi1> to vector<1x512xi1>
    %64 = vector.broadcast %63 : vector<1x512xi1> to vector<8x512xi1>
    %65 = vector.broadcast %cst_27 : f32 to vector<8x512xf32>
    %66 = arith.select %64, %62, %65 : vector<8x512xi1>, vector<8x512xf32>
    %c3 = arith.constant 3 : index
    %c0_28 = arith.constant 0 : index
    %c0_29 = arith.constant 0 : index
    %67 = vector.load %arg2[%c3, %c0_28, %c0_29] : memref<9x8x8xf32, #tpu.memory_space<vmem>>, vector<1x8x8xf32>
    %68 = vector.shape_cast %67 : vector<1x8x8xf32> to vector<8x8xf32>
    %cst_30 = arith.constant dense<0.000000e+00> : vector<8x512xf32>
    %69 = tpu.matmul %68, %66, %cst_30 {dimension_numbers = #tpu.dot_dimension_numbers<[1], [0], [0], [1], [0, 0, 1, 1], [], []>} : vector<8x8xf32>, vector<8x512xf32>, vector<8x512xf32> -> vector<8x512xf32>
    %70 = arith.addf %61, %69 : vector<8x512xf32>
    %c4 = arith.constant 4 : index
    %c0_31 = arith.constant 0 : index
    %c0_32 = arith.constant 0 : index
    %71 = vector.load %arg2[%c4, %c0_31, %c0_32] : memref<9x8x8xf32, #tpu.memory_space<vmem>>, vector<1x8x8xf32>
    %72 = vector.shape_cast %71 : vector<1x8x8xf32> to vector<8x8xf32>
    %cst_33 = arith.constant dense<0.000000e+00> : vector<8x512xf32>
    %73 = tpu.matmul %72, %35, %cst_33 {dimension_numbers = #tpu.dot_dimension_numbers<[1], [0], [0], [1], [0, 0, 1, 1], [], []>} : vector<8x8xf32>, vector<8x512xf32>, vector<8x512xf32> -> vector<8x512xf32>
    %74 = arith.addf %70, %73 : vector<8x512xf32>
    %c511_i32 = arith.constant 511 : i32
    %75 = tpu.dynamic_rotate %35 by %c511_i32 dim 1 : vector<8x512xf32>, i32 -> vector<8x512xf32>
    %cst_34 = arith.constant 0.000000e+00 : f32
    %76 = vector.shape_cast %22 : vector<1x512xi1> to vector<1x512xi1>
    %77 = vector.broadcast %76 : vector<1x512xi1> to vector<8x512xi1>
    %78 = vector.broadcast %cst_34 : f32 to vector<8x512xf32>
    %79 = arith.select %77, %75, %78 : vector<8x512xi1>, vector<8x512xf32>
    %c5 = arith.constant 5 : index
    %c0_35 = arith.constant 0 : index
    %c0_36 = arith.constant 0 : index
    %80 = vector.load %arg2[%c5, %c0_35, %c0_36] : memref<9x8x8xf32, #tpu.memory_space<vmem>>, vector<1x8x8xf32>
    %81 = vector.shape_cast %80 : vector<1x8x8xf32> to vector<8x8xf32>
    %cst_37 = arith.constant dense<0.000000e+00> : vector<8x512xf32>
    %82 = tpu.matmul %81, %79, %cst_37 {dimension_numbers = #tpu.dot_dimension_numbers<[1], [0], [0], [1], [0, 0, 1, 1], [], []>} : vector<8x8xf32>, vector<8x512xf32>, vector<8x512xf32> -> vector<8x512xf32>
    %83 = arith.addf %74, %82 : vector<8x512xf32>
    %c497_i32 = arith.constant 497 : i32
    %84 = tpu.dynamic_rotate %35 by %c497_i32 dim 1 : vector<8x512xf32>, i32 -> vector<8x512xf32>
    %cst_38 = arith.constant 0.000000e+00 : f32
    %85 = vector.shape_cast %27 : vector<1x512xi1> to vector<1x512xi1>
    %86 = vector.broadcast %85 : vector<1x512xi1> to vector<8x512xi1>
    %87 = vector.broadcast %cst_38 : f32 to vector<8x512xf32>
    %88 = arith.select %86, %84, %87 : vector<8x512xi1>, vector<8x512xf32>
    %c6 = arith.constant 6 : index
    %c0_39 = arith.constant 0 : index
    %c0_40 = arith.constant 0 : index
    %89 = vector.load %arg2[%c6, %c0_39, %c0_40] : memref<9x8x8xf32, #tpu.memory_space<vmem>>, vector<1x8x8xf32>
    %90 = vector.shape_cast %89 : vector<1x8x8xf32> to vector<8x8xf32>
    %cst_41 = arith.constant dense<0.000000e+00> : vector<8x512xf32>
    %91 = tpu.matmul %90, %88, %cst_41 {dimension_numbers = #tpu.dot_dimension_numbers<[1], [0], [0], [1], [0, 0, 1, 1], [], []>} : vector<8x8xf32>, vector<8x512xf32>, vector<8x512xf32> -> vector<8x512xf32>
    %92 = arith.addf %83, %91 : vector<8x512xf32>
    %c496_i32 = arith.constant 496 : i32
    %93 = tpu.dynamic_rotate %35 by %c496_i32 dim 1 : vector<8x512xf32>, i32 -> vector<8x512xf32>
    %cst_42 = arith.constant 0.000000e+00 : f32
    %94 = vector.shape_cast %29 : vector<1x512xi1> to vector<1x512xi1>
    %95 = vector.broadcast %94 : vector<1x512xi1> to vector<8x512xi1>
    %96 = vector.broadcast %cst_42 : f32 to vector<8x512xf32>
    %97 = arith.select %95, %93, %96 : vector<8x512xi1>, vector<8x512xf32>
    %c7 = arith.constant 7 : index
    %c0_43 = arith.constant 0 : index
    %c0_44 = arith.constant 0 : index
    %98 = vector.load %arg2[%c7, %c0_43, %c0_44] : memref<9x8x8xf32, #tpu.memory_space<vmem>>, vector<1x8x8xf32>
    %99 = vector.shape_cast %98 : vector<1x8x8xf32> to vector<8x8xf32>
    %cst_45 = arith.constant dense<0.000000e+00> : vector<8x512xf32>
    %100 = tpu.matmul %99, %97, %cst_45 {dimension_numbers = #tpu.dot_dimension_numbers<[1], [0], [0], [1], [0, 0, 1, 1], [], []>} : vector<8x8xf32>, vector<8x512xf32>, vector<8x512xf32> -> vector<8x512xf32>
    %101 = arith.addf %92, %100 : vector<8x512xf32>
    %c495_i32 = arith.constant 495 : i32
    %102 = tpu.dynamic_rotate %35 by %c495_i32 dim 1 : vector<8x512xf32>, i32 -> vector<8x512xf32>
    %cst_46 = arith.constant 0.000000e+00 : f32
    %103 = vector.shape_cast %34 : vector<1x512xi1> to vector<1x512xi1>
    %104 = vector.broadcast %103 : vector<1x512xi1> to vector<8x512xi1>
    %105 = vector.broadcast %cst_46 : f32 to vector<8x512xf32>
    %106 = arith.select %104, %102, %105 : vector<8x512xi1>, vector<8x512xf32>
    %c8 = arith.constant 8 : index
    %c0_47 = arith.constant 0 : index
    %c0_48 = arith.constant 0 : index
    %107 = vector.load %arg2[%c8, %c0_47, %c0_48] : memref<9x8x8xf32, #tpu.memory_space<vmem>>, vector<1x8x8xf32>
    %108 = vector.shape_cast %107 : vector<1x8x8xf32> to vector<8x8xf32>
    %cst_49 = arith.constant dense<0.000000e+00> : vector<8x512xf32>
    %109 = tpu.matmul %108, %106, %cst_49 {dimension_numbers = #tpu.dot_dimension_numbers<[1], [0], [0], [1], [0, 0, 1, 1], [], []>} : vector<8x8xf32>, vector<8x512xf32>, vector<8x512xf32> -> vector<8x512xf32>
    %110 = arith.addf %101, %109 : vector<8x512xf32>
    %cst_50 = arith.constant 0.000000e+00 : f32
    %111 = vector.broadcast %cst_50 : f32 to vector<8x512xf32>
    %112 = arith.maximumf %110, %111 : vector<8x512xf32>
    %c17_i32_51 = arith.constant 17 : i32
    %113 = tpu.dynamic_rotate %112 by %c17_i32_51 dim 1 : vector<8x512xf32>, i32 -> vector<8x512xf32>
    %cst_52 = arith.constant 0.000000e+00 : f32
    %114 = vector.shape_cast %11 : vector<1x512xi1> to vector<1x512xi1>
    %115 = vector.broadcast %114 : vector<1x512xi1> to vector<8x512xi1>
    %116 = vector.broadcast %cst_52 : f32 to vector<8x512xf32>
    %117 = arith.select %115, %113, %116 : vector<8x512xi1>, vector<8x512xf32>
    %c0_53 = arith.constant 0 : index
    %c0_54 = arith.constant 0 : index
    %c0_55 = arith.constant 0 : index
    %118 = vector.load %arg3[%c0_53, %c0_54, %c0_55] : memref<9x8x8xf32, #tpu.memory_space<vmem>>, vector<1x8x8xf32>
    %119 = vector.shape_cast %118 : vector<1x8x8xf32> to vector<8x8xf32>
    %cst_56 = arith.constant dense<0.000000e+00> : vector<8x512xf32>
    %120 = tpu.matmul %119, %117, %cst_56 {dimension_numbers = #tpu.dot_dimension_numbers<[1], [0], [0], [1], [0, 0, 1, 1], [], []>} : vector<8x8xf32>, vector<8x512xf32>, vector<8x512xf32> -> vector<8x512xf32>
    %c16_i32_57 = arith.constant 16 : i32
    %121 = tpu.dynamic_rotate %112 by %c16_i32_57 dim 1 : vector<8x512xf32>, i32 -> vector<8x512xf32>
    %cst_58 = arith.constant 0.000000e+00 : f32
    %122 = vector.shape_cast %13 : vector<1x512xi1> to vector<1x512xi1>
    %123 = vector.broadcast %122 : vector<1x512xi1> to vector<8x512xi1>
    %124 = vector.broadcast %cst_58 : f32 to vector<8x512xf32>
    %125 = arith.select %123, %121, %124 : vector<8x512xi1>, vector<8x512xf32>
    %c1_59 = arith.constant 1 : index
    %c0_60 = arith.constant 0 : index
    %c0_61 = arith.constant 0 : index
    %126 = vector.load %arg3[%c1_59, %c0_60, %c0_61] : memref<9x8x8xf32, #tpu.memory_space<vmem>>, vector<1x8x8xf32>
    %127 = vector.shape_cast %126 : vector<1x8x8xf32> to vector<8x8xf32>
    %cst_62 = arith.constant dense<0.000000e+00> : vector<8x512xf32>
    %128 = tpu.matmul %127, %125, %cst_62 {dimension_numbers = #tpu.dot_dimension_numbers<[1], [0], [0], [1], [0, 0, 1, 1], [], []>} : vector<8x8xf32>, vector<8x512xf32>, vector<8x512xf32> -> vector<8x512xf32>
    %129 = arith.addf %120, %128 : vector<8x512xf32>
    %c15_i32_63 = arith.constant 15 : i32
    %130 = tpu.dynamic_rotate %112 by %c15_i32_63 dim 1 : vector<8x512xf32>, i32 -> vector<8x512xf32>
    %cst_64 = arith.constant 0.000000e+00 : f32
    %131 = vector.shape_cast %18 : vector<1x512xi1> to vector<1x512xi1>
    %132 = vector.broadcast %131 : vector<1x512xi1> to vector<8x512xi1>
    %133 = vector.broadcast %cst_64 : f32 to vector<8x512xf32>
    %134 = arith.select %132, %130, %133 : vector<8x512xi1>, vector<8x512xf32>
    %c2_65 = arith.constant 2 : index
    %c0_66 = arith.constant 0 : index
    %c0_67 = arith.constant 0 : index
    %135 = vector.load %arg3[%c2_65, %c0_66, %c0_67] : memref<9x8x8xf32, #tpu.memory_space<vmem>>, vector<1x8x8xf32>
    %136 = vector.shape_cast %135 : vector<1x8x8xf32> to vector<8x8xf32>
    %cst_68 = arith.constant dense<0.000000e+00> : vector<8x512xf32>
    %137 = tpu.matmul %136, %134, %cst_68 {dimension_numbers = #tpu.dot_dimension_numbers<[1], [0], [0], [1], [0, 0, 1, 1], [], []>} : vector<8x8xf32>, vector<8x512xf32>, vector<8x512xf32> -> vector<8x512xf32>
    %138 = arith.addf %129, %137 : vector<8x512xf32>
    %c1_i32_69 = arith.constant 1 : i32
    %139 = tpu.dynamic_rotate %112 by %c1_i32_69 dim 1 : vector<8x512xf32>, i32 -> vector<8x512xf32>
    %cst_70 = arith.constant 0.000000e+00 : f32
    %140 = vector.shape_cast %20 : vector<1x512xi1> to vector<1x512xi1>
    %141 = vector.broadcast %140 : vector<1x512xi1> to vector<8x512xi1>
    %142 = vector.broadcast %cst_70 : f32 to vector<8x512xf32>
    %143 = arith.select %141, %139, %142 : vector<8x512xi1>, vector<8x512xf32>
    %c3_71 = arith.constant 3 : index
    %c0_72 = arith.constant 0 : index
    %c0_73 = arith.constant 0 : index
    %144 = vector.load %arg3[%c3_71, %c0_72, %c0_73] : memref<9x8x8xf32, #tpu.memory_space<vmem>>, vector<1x8x8xf32>
    %145 = vector.shape_cast %144 : vector<1x8x8xf32> to vector<8x8xf32>
    %cst_74 = arith.constant dense<0.000000e+00> : vector<8x512xf32>
    %146 = tpu.matmul %145, %143, %cst_74 {dimension_numbers = #tpu.dot_dimension_numbers<[1], [0], [0], [1], [0, 0, 1, 1], [], []>} : vector<8x8xf32>, vector<8x512xf32>, vector<8x512xf32> -> vector<8x512xf32>
    %147 = arith.addf %138, %146 : vector<8x512xf32>
    %c4_75 = arith.constant 4 : index
    %c0_76 = arith.constant 0 : index
    %c0_77 = arith.constant 0 : index
    %148 = vector.load %arg3[%c4_75, %c0_76, %c0_77] : memref<9x8x8xf32, #tpu.memory_space<vmem>>, vector<1x8x8xf32>
    %149 = vector.shape_cast %148 : vector<1x8x8xf32> to vector<8x8xf32>
    %cst_78 = arith.constant dense<0.000000e+00> : vector<8x512xf32>
    %150 = tpu.matmul %149, %112, %cst_78 {dimension_numbers = #tpu.dot_dimension_numbers<[1], [0], [0], [1], [0, 0, 1, 1], [], []>} : vector<8x8xf32>, vector<8x512xf32>, vector<8x512xf32> -> vector<8x512xf32>
    %151 = arith.addf %147, %150 : vector<8x512xf32>
    %c511_i32_79 = arith.constant 511 : i32
    %152 = tpu.dynamic_rotate %112 by %c511_i32_79 dim 1 : vector<8x512xf32>, i32 -> vector<8x512xf32>
    %cst_80 = arith.constant 0.000000e+00 : f32
    %153 = vector.shape_cast %22 : vector<1x512xi1> to vector<1x512xi1>
    %154 = vector.broadcast %153 : vector<1x512xi1> to vector<8x512xi1>
    %155 = vector.broadcast %cst_80 : f32 to vector<8x512xf32>
    %156 = arith.select %154, %152, %155 : vector<8x512xi1>, vector<8x512xf32>
    %c5_81 = arith.constant 5 : index
    %c0_82 = arith.constant 0 : index
    %c0_83 = arith.constant 0 : index
    %157 = vector.load %arg3[%c5_81, %c0_82, %c0_83] : memref<9x8x8xf32, #tpu.memory_space<vmem>>, vector<1x8x8xf32>
    %158 = vector.shape_cast %157 : vector<1x8x8xf32> to vector<8x8xf32>
    %cst_84 = arith.constant dense<0.000000e+00> : vector<8x512xf32>
    %159 = tpu.matmul %158, %156, %cst_84 {dimension_numbers = #tpu.dot_dimension_numbers<[1], [0], [0], [1], [0, 0, 1, 1], [], []>} : vector<8x8xf32>, vector<8x512xf32>, vector<8x512xf32> -> vector<8x512xf32>
    %160 = arith.addf %151, %159 : vector<8x512xf32>
    %c497_i32_85 = arith.constant 497 : i32
    %161 = tpu.dynamic_rotate %112 by %c497_i32_85 dim 1 : vector<8x512xf32>, i32 -> vector<8x512xf32>
    %cst_86 = arith.constant 0.000000e+00 : f32
    %162 = vector.shape_cast %27 : vector<1x512xi1> to vector<1x512xi1>
    %163 = vector.broadcast %162 : vector<1x512xi1> to vector<8x512xi1>
    %164 = vector.broadcast %cst_86 : f32 to vector<8x512xf32>
    %165 = arith.select %163, %161, %164 : vector<8x512xi1>, vector<8x512xf32>
    %c6_87 = arith.constant 6 : index
    %c0_88 = arith.constant 0 : index
    %c0_89 = arith.constant 0 : index
    %166 = vector.load %arg3[%c6_87, %c0_88, %c0_89] : memref<9x8x8xf32, #tpu.memory_space<vmem>>, vector<1x8x8xf32>
    %167 = vector.shape_cast %166 : vector<1x8x8xf32> to vector<8x8xf32>
    %cst_90 = arith.constant dense<0.000000e+00> : vector<8x512xf32>
    %168 = tpu.matmul %167, %165, %cst_90 {dimension_numbers = #tpu.dot_dimension_numbers<[1], [0], [0], [1], [0, 0, 1, 1], [], []>} : vector<8x8xf32>, vector<8x512xf32>, vector<8x512xf32> -> vector<8x512xf32>
    %169 = arith.addf %160, %168 : vector<8x512xf32>
    %c496_i32_91 = arith.constant 496 : i32
    %170 = tpu.dynamic_rotate %112 by %c496_i32_91 dim 1 : vector<8x512xf32>, i32 -> vector<8x512xf32>
    %cst_92 = arith.constant 0.000000e+00 : f32
    %171 = vector.shape_cast %29 : vector<1x512xi1> to vector<1x512xi1>
    %172 = vector.broadcast %171 : vector<1x512xi1> to vector<8x512xi1>
    %173 = vector.broadcast %cst_92 : f32 to vector<8x512xf32>
    %174 = arith.select %172, %170, %173 : vector<8x512xi1>, vector<8x512xf32>
    %c7_93 = arith.constant 7 : index
    %c0_94 = arith.constant 0 : index
    %c0_95 = arith.constant 0 : index
    %175 = vector.load %arg3[%c7_93, %c0_94, %c0_95] : memref<9x8x8xf32, #tpu.memory_space<vmem>>, vector<1x8x8xf32>
    %176 = vector.shape_cast %175 : vector<1x8x8xf32> to vector<8x8xf32>
    %cst_96 = arith.constant dense<0.000000e+00> : vector<8x512xf32>
    %177 = tpu.matmul %176, %174, %cst_96 {dimension_numbers = #tpu.dot_dimension_numbers<[1], [0], [0], [1], [0, 0, 1, 1], [], []>} : vector<8x8xf32>, vector<8x512xf32>, vector<8x512xf32> -> vector<8x512xf32>
    %178 = arith.addf %169, %177 : vector<8x512xf32>
    %c495_i32_97 = arith.constant 495 : i32
    %179 = tpu.dynamic_rotate %112 by %c495_i32_97 dim 1 : vector<8x512xf32>, i32 -> vector<8x512xf32>
    %cst_98 = arith.constant 0.000000e+00 : f32
    %180 = vector.shape_cast %34 : vector<1x512xi1> to vector<1x512xi1>
    %181 = vector.broadcast %180 : vector<1x512xi1> to vector<8x512xi1>
    %182 = vector.broadcast %cst_98 : f32 to vector<8x512xf32>
    %183 = arith.select %181, %179, %182 : vector<8x512xi1>, vector<8x512xf32>
    %c8_99 = arith.constant 8 : index
    %c0_100 = arith.constant 0 : index
    %c0_101 = arith.constant 0 : index
    %184 = vector.load %arg3[%c8_99, %c0_100, %c0_101] : memref<9x8x8xf32, #tpu.memory_space<vmem>>, vector<1x8x8xf32>
    %185 = vector.shape_cast %184 : vector<1x8x8xf32> to vector<8x8xf32>
    %cst_102 = arith.constant dense<0.000000e+00> : vector<8x512xf32>
    %186 = tpu.matmul %185, %183, %cst_102 {dimension_numbers = #tpu.dot_dimension_numbers<[1], [0], [0], [1], [0, 0, 1, 1], [], []>} : vector<8x8xf32>, vector<8x512xf32>, vector<8x512xf32> -> vector<8x512xf32>
    %187 = arith.addf %178, %186 : vector<8x512xf32>
    %cst_103 = arith.constant 0.000000e+00 : f32
    %188 = vector.broadcast %cst_103 : f32 to vector<8x512xf32>
    %189 = arith.maximumf %187, %188 : vector<8x512xf32>
    %c511_i32_104 = arith.constant 511 : i32
    %190 = tpu.dynamic_rotate %189 by %c511_i32_104 dim 1 : vector<8x512xf32>, i32 -> vector<8x512xf32>
    %191 = arith.maximumf %189, %190 : vector<8x512xf32>
    %c496_i32_105 = arith.constant 496 : i32
    %192 = tpu.dynamic_rotate %191 by %c496_i32_105 dim 1 : vector<8x512xf32>, i32 -> vector<8x512xf32>
    %193 = arith.maximumf %191, %192 : vector<8x512xf32>
    %c0_106 = arith.constant 0 : index
    %c0_107 = arith.constant 0 : index
    %194 = vector.load %arg4[%c0_106, %c0_107] : memref<512x128xf32, #tpu.memory_space<vmem>>, vector<512x128xf32>
    %cst_108 = arith.constant dense<0.000000e+00> : vector<8x128xf32>
    %195 = tpu.matmul %193, %194, %cst_108 {dimension_numbers = #tpu.dot_dimension_numbers<[1], [0], [0], [1], [0, 0, 1, 1], [], []>} : vector<8x512xf32>, vector<512x128xf32>, vector<8x128xf32> -> vector<8x128xf32>
    %c0_109 = arith.constant 0 : index
    %c0_110 = arith.constant 0 : index
    %196 = vector.load %arg5[%c0_109, %c0_110] : memref<8x128xf32, #tpu.memory_space<vmem>>, vector<8x128xf32>
    tpu.vector_store %arg5[%c0_109, %c0_110], %195 {strides = array<i32>} : memref<8x128xf32, #tpu.memory_space<vmem>>, vector<8x128xf32>,
    return
  }
  func.func @transform_0(%arg0: i32) -> (i32, i32) {
    %c0_i32 = arith.constant 0 : i32
    %c0_i32_0 = arith.constant 0 : i32
    return %c0_i32, %arg0 : i32, i32
  }
  func.func @transform_1(%arg0: i32) -> (i32, i32, i32) {
    %c0_i32 = arith.constant 0 : i32
    %c0_i32_0 = arith.constant 0 : i32
    %c0_i32_1 = arith.constant 0 : i32
    %c0_i32_2 = arith.constant 0 : i32
    return %c0_i32, %c0_i32_0, %c0_i32_1 : i32, i32, i32
  }
  func.func @transform_2(%arg0: i32) -> (i32, i32, i32) {
    %c0_i32 = arith.constant 0 : i32
    %c0_i32_0 = arith.constant 0 : i32
    %c0_i32_1 = arith.constant 0 : i32
    %c0_i32_2 = arith.constant 0 : i32
    return %c0_i32, %c0_i32_0, %c0_i32_1 : i32, i32, i32
  }
  func.func @transform_3(%arg0: i32) -> (i32, i32) {
    %c0_i32 = arith.constant 0 : i32
    %c0_i32_0 = arith.constant 0 : i32
    %c0_i32_1 = arith.constant 0 : i32
    return %c0_i32, %c0_i32_0 : i32, i32
  }
  func.func @transform_4(%arg0: i32) -> (i32, i32) {
    %c0_i32 = arith.constant 0 : i32
    %c0_i32_0 = arith.constant 0 : i32
    return %c0_i32, %arg0 : i32, i32
  }
}

</mosaic_0001>

<bundles_post_ra>
// kernel: dcb_old_forward.1
= control target key start
LH: loop header
LB: loop body
LE: loop exit
PB: predicated region body
PF: predicated region fallthrough
CT: control target
= control target key end

     0   :  { %v3691_v2 = vmov 0.0   ;;  %s3692_s19 = smov 16   ;;  %s3693_s24 = smov 17   ;;  %v17_v5 = vlaneseq  ;;  %vm4723_vm1 = vcmask 64512   ;;  %v4754_v33 = vmov 0  ;;  %s4713_s0 = inlined_call_operand.vmem [shape: f32[8,512], index: 0, kind: input, shape index: {}]   ;;  %s4714_s1 = inlined_call_operand.vmem [shape: f32[9,8,8], index: 1, kind: input, shape index: {}]   ;;  %s4715_s2 = inlined_call_operand.vmem [shape: f32[9,8,8], index: 2, kind: input, shape index: {}]   ;;  %s4716_s3 = inlined_call_operand.vmem [shape: f32[512,128], index: 3, kind: input, shape index: {}]   ;;  %s4717_s4 = inlined_call_operand.vmem [shape: f32[8,128], index: 4, kind: output, shape index: {}]  }
   0x1   :  { %v3728_v0 = vld [vmem:[%s4713_s0 + $0x10] sm:$0xff]  ;;  %v3733_v1 = vld [vmem:[%s4713_s0] sm:$0xff]  ;;  %191 = vmatprep.mubr.f32.mxu0 %v3691_v2  ;;  %262 = vmatprep.mubr.f32.mxu1 %v3691_v2  ;;  %v3744_v3 = vld [vmem:[%s4713_s0 + $0x18] sm:$0xff]  ;;  %s3695_s25 = smov 1   ;;  %s3696_s26 = smov 127   ;;  %v4756_v36 = vmov 0 }
   0x2   :  { %100 = vrot.lane.b32.xlu1 %v3728_v0, %s3692_s19  ;;  %96 = vrot.lane.b32.xlu0 %v3733_v1, %s3692_s19  ;;  %v3749_v4 = vld [vmem:[%s4713_s0 + $0x8] sm:$0xff]  ;;  %s3694_s0 = smov 15   ;;  %s3697_s27 = smov 113   ;;  %v3811_v6 = vand.u32 127, %v17_v5  ;;  %v4760_v39 = vmov 0  ;;  %v4762_v40 = vmov 0 }
   0x3   :  { %s3698_s28 = smov 112   ;;  %s3699_s29 = smov 111   ;;  %v3348_v31 = vld [vmem:[%s4714_s1 + $0x8] sm:$0xff]  ;;  %v4764_v43 = vmov 0  ;;  %v95_v48 = vld [vmem:[%s4714_s1] sm:$0xff]  ;;  %v4768_v49 = vmov 0 }
   0x4   :  { %v19_v7 = vadd.s32 128, %v3811_v6  ;;  %v3815_v8 = vadd.s32 384, %v3811_v6  ;;  %v3818_v9 = vadd.s32 256, %v3811_v6  ;;  %v26_v12 = vshra.s32 %v3811_v6, 4  ;;  %v3361_v5 = vld [vmem:[%s4714_s1 + $0x10] sm:$0xff]  ;;  %v3436_v50 = vld [vmem:[%s4715_s2 + $0x28] sm:$0xff] }
   0x5   :  { %vm4718_vm0 = vcmp.lt.s32.totalorder %v3811_v6, 16  ;;  %v22_v22 = vand.u32 15, %v3811_v6  ;;  %vm4719_vm7 = vcmp.lt.s32.totalorder %v3811_v6, 17  ;;  %v4779_v57 = vmov 0 }
   0x6   :  { %102 = vrot.lane.b32.xlu1 %v3744_v3, %s3692_s19  ;;  %98 = vrot.lane.b32.xlu0 %v3749_v4, %s3692_s19  ;;  %v27_v10 = vshra.s32 %v19_v7, 4  ;;  %v29_v11 = vshra.s32 %v3815_v8, 4  ;;  %v28_v13 = vshra.s32 %v3818_v9, 4  ;;  %v3827_v18 = vand.u32 15, %v26_v12 }
   0x7   :  { %v23_v20 = vand.u32 15, %v19_v7  ;;  %v24_v21 = vand.u32 15, %v3818_v9  ;;  %v25_v26 = vand.u32 15, %v3815_v8  ;;  %vm3871_vm9 = vcmp.ge.s32.totalorder %v22_v22, 1 }
   0x8   :  { %v3823_v14 = vand.u32 15, %v27_v10  ;;  %v3825_v15 = vand.u32 15, %v29_v11  ;;  %v3829_v19 = vand.u32 15, %v28_v13  ;;  %vm4728_vm4 = vcmp.ge.s32.totalorder %v3827_v18, 1 }
   0x9   :  { %vm3838_vm6 = vcmp.ge.s32.totalorder %v23_v20, 1  ;;  %v4755_v33 = vsel %vm3871_vm9, 4294967295, %v4754_v33  ;;  %vm3877_vm10 = vcmp.ge.s32.totalorder %v25_v26, 1  ;;  %vm3884_vm11 = vcmp.ge.s32.totalorder %v24_v21, 1  ;;  %vm3895_vm12 = vmand %vm4728_vm4, %vm3871_vm9 }
   0xa   :  { %72 = vrot.lane.b32.xlu1 %v3749_v4, %s3693_s24  ;;  %70 = vrot.lane.b32.xlu0 %v3733_v1, %s3693_s24  ;;  %vm4722_vm2 = vcmp.ge.s32.totalorder %v3823_v14, 1  ;;  %vm4721_vm3 = vcmp.ge.s32.totalorder %v3825_v15, 1  ;;  %vm4720_vm5 = vcmp.ge.s32.totalorder %v3829_v19, 1  ;;  %v4757_v36 = vsel %vm3877_vm10, 4294967295, %v4756_v36 }
   0xb   :  { %vm3867_vm8 = vmand %vm4722_vm2, %vm3838_vm6  ;;  %v4761_v39 = vsel %vm3895_vm12, 4294967295, %v4760_v39  ;;  %vm3915_vm15 = vcmp.lt.s32.totalorder %v23_v20, 15  ;;  %v4782_v60 = vmov 0 }
   0xc   :  { %vm3903_vm13 = vmand %vm4721_vm3, %vm3877_vm10 }
   0xd   :  { %v4763_v40 = vsel %vm3903_vm13, 4294967295, %v4762_v40  ;;  %vm3911_vm14 = vmand %vm4720_vm5, %vm3884_vm11 }
   0xe   :  { %76 = vrot.lane.b32.xlu1 %v3744_v3, %s3693_s24  ;;  %74 = vrot.lane.b32.xlu0 %v3728_v0, %s3693_s24  ;;  %v4765_v43 = vsel %vm3911_vm14, 4294967295, %v4764_v43 }
  0x12   :  { %416 = vrot.lane.b32.xlu1 %v3749_v4, %s3694_s0  ;;  %414 = vrot.lane.b32.xlu0 %v3733_v1, %s3694_s0 }
  0x16   :  { %420 = vrot.lane.b32.xlu1 %v3744_v3, %s3694_s0  ;;  %418 = vrot.lane.b32.xlu0 %v3728_v0, %s3694_s0 }
  0x1a   :  { %592 = vrot.lane.b32.xlu1 %v3749_v4, %s3695_s25  ;;  %590 = vrot.lane.b32.xlu0 %v3733_v1, %s3695_s25 }
  0x1e   :  { %596 = vrot.lane.b32.xlu1 %v3744_v3, %s3695_s25  ;;  %594 = vrot.lane.b32.xlu0 %v3728_v0, %s3695_s25 }
  0x22   :  { %917 = vrot.lane.b32.xlu0 %v3733_v1, %s3696_s26  ;;  %919 = vrot.lane.b32.xlu1 %v3749_v4, %s3696_s26 }
  0x26   :  { %921 = vrot.lane.b32.xlu0 %v3728_v0, %s3696_s26  ;;  %923 = vrot.lane.b32.xlu1 %v3744_v3, %s3696_s26 }
  0x2a   :  { %1093 = vrot.lane.b32.xlu0 %v3733_v1, %s3697_s27  ;;  %1095 = vrot.lane.b32.xlu1 %v3749_v4, %s3697_s27 }
  0x2e   :  { %1097 = vrot.lane.b32.xlu0 %v3728_v0, %s3697_s27  ;;  %1099 = vrot.lane.b32.xlu1 %v3744_v3, %s3697_s27 }
  0x32   :  { %1269 = vrot.lane.b32.xlu0 %v3733_v1, %s3698_s28  ;;  %1271 = vrot.lane.b32.xlu1 %v3749_v4, %s3698_s28 }
  0x36   :  { %1273 = vrot.lane.b32.xlu0 %v3728_v0, %s3698_s28  ;;  %1275 = vrot.lane.b32.xlu1 %v3744_v3, %s3698_s28 }
  0x3a   :  { %1445 = vrot.lane.b32.xlu0 %v3733_v1, %s3699_s29  ;;  %1447 = vrot.lane.b32.xlu1 %v3749_v4, %s3699_s29 }
  0x3e   :  { %1449 = vrot.lane.b32.xlu0 %v3728_v0, %s3699_s29  ;;  %1451 = vrot.lane.b32.xlu1 %v3744_v3, %s3699_s29 }
  0x74   :  { %v101_v16 = vpop.permute.xlu1 %100  ;;  %v97_v17 = vpop.permute.xlu0 %96 }
  0x78   :  { %v103_v23 = vpop.permute.xlu1 %102  ;;  %v99_v24 = vpop.permute.xlu0 %98 }
  0x79   :  { %v107_v27 = vsel %vm4718_vm0, %v97_v17, %v99_v24  ;;  %v105_v28 = vsel %vm4718_vm0, %v101_v16, %v103_v23  ;;  %v108_v29 = vsel %vm4718_vm0, %v103_v23, %v97_v17  ;;  %v106_v30 = vsel %vm4718_vm0, %v99_v24, %v101_v16  ;;  %v3368_v17 = vld [vmem:[%s4714_s1 + $0x18] sm:$0xff] }
  0x7a   :  { %3349 = vmatprep.subr.msk.mxu0 %vm4722_vm2, %v107_v27  ;;  %3352 = vmatprep.subr.msk.mxu1 %vm4721_vm3, %v105_v28  ;;  %vm4724_vm0 = vcmp.lt.s32.totalorder %v3811_v6, 15  ;;  %vm3949_vm3 = vcmp.lt.s32.totalorder %v25_v26, 15  ;;  %v4792_v28 = vmov 0 }
  0x7b   :  { %3350 = vmatpush1.msk.msra.mxu0 %vm4728_vm4, %v108_v29  ;;  %3353 = vmatpush1.msk.msra.mxu1 %vm4720_vm5, %v106_v30  ;;  %vm3943_vm5 = vcmp.lt.s32.totalorder %v22_v22, 15  ;;  %v4794_v29 = vmov 0 }
  0x7c   :  { %v73_v34 = vpop.permute.xlu1 %72  ;;  %3351 = vmatmul.mubr.msk.f32.vlgmr.msra.gmra.mrb[0].mxu0 %vm4723_vm1, %v3348_v31  ;;  %3354 = vmatmul.mubr.msk.f32.vlgmr.msra.gmra.mrb[0].mxu1 %vm4723_vm1, %v3348_v31  ;;  %v71_v35 = vpop.permute.xlu0 %70 }
  0x7d   :  { %v81_v37 = vsel %vm4719_vm7, %v71_v35, %v73_v34  ;;  %336 = vmatprep.mubr.f32.mxu0 %v3691_v2  ;;  %407 = vmatprep.mubr.f32.mxu1 %v3691_v2 }
  0x7e   :  { %3355 = vmatprep.subr.msk.mxu0 %vm3867_vm8, %v81_v37  ;;  %v3378_v37 = vld [vmem:[%s4714_s1 + $0x28] sm:$0xff] }
  0x80   :  { %v77_v41 = vpop.permute.xlu1 %76  ;;  %v75_v42 = vpop.permute.xlu0 %74 }
  0x81   :  { %v82_v45 = vsel %vm4719_vm7, %v77_v41, %v71_v35  ;;  %v79_v46 = vsel %vm4719_vm7, %v75_v42, %v77_v41  ;;  %v80_v47 = vsel %vm4719_vm7, %v73_v34, %v75_v42  ;;  %vm3939_vm7 = vmand %vm4722_vm2, %vm3915_vm15  ;;  %vm3956_vm2 = vcmp.lt.s32.totalorder %v24_v21, 15 }
  0x82   :  { %3356 = vmatpush1.msk.msra.mxu0 %vm3895_vm12, %v82_v45  ;;  %3358 = vmatprep.subr.msk.mxu1 %vm3903_vm13, %v79_v46  ;;  %v4769_v49 = vsel %vm3939_vm7, 4294967295, %v4768_v49  ;;  %v4797_v41 = vmov 0  ;;  %v4799_v46 = vmov 0 }
  0x83   :  { %3359 = vmatpush1.msk.msra.mxu1 %vm3911_vm14, %v80_v47 }
  0x84   :  { %v417_v51 = vpop.permute.xlu1 %416  ;;  %3357 = vmatmul.mubr.msk.f32.vlgmr.msra.gmra.mrb[0].mxu0 %vm4723_vm1, %v95_v48  ;;  %3360 = vmatmul.mubr.msk.f32.vlgmr.msra.gmra.mrb[0].mxu1 %vm4723_vm1, %v95_v48  ;;  %v415_v52 = vpop.permute.xlu0 %414  ;;  %vm3967_vm1 = vmand %vm4728_vm4, %vm3943_vm5  ;;  %vm4784_vm4 = vcmp.lt.s32.totalorder %v3811_v6, 15 }
  0x85   :  { %v425_v54 = vsel %vm4724_vm0, %v415_v52, %v417_v51  ;;  %508 = vmatprep.mubr.f32.mxu0 %v3691_v2  ;;  %579 = vmatprep.mubr.f32.mxu1 %v3691_v2  ;;  %vm4778_vm0 = vcmp.ge.s32.totalorder %v3825_v15, 1  ;;  %vm4785_vm12 = vmmov %vm4784_vm4 }
  0x86   :  { %3362 = vmatprep.subr.msk.mxu0 %vm3939_vm7, %v425_v54  ;;  %vm3975_vm14 = vmand %vm4778_vm0, %vm3949_vm3  ;;  %vm4781_vm7 = vcmp.ge.s32.totalorder %v3829_v19, 1 }
  0x87   :  { %v4780_v57 = vsel %vm3975_vm14, 4294967295, %v4779_v57  ;;  %vm3983_vm13 = vmand %vm4781_vm7, %vm3956_vm2  ;;  %vm4730_vm7 = vcmp.lt.s32.totalorder %v3811_v6, 1 }
  0x88   :  { %v421_v58 = vpop.permute.xlu1 %420  ;;  %v419_v59 = vpop.permute.xlu0 %418  ;;  %v4783_v60 = vsel %vm3983_vm13, 4294967295, %v4782_v60  ;;  %vm4786_vm0 = vmmov %vm4784_vm4 }
  0x89   :  { %v426_v61 = vsel %vm4784_vm4, %v421_v58, %v415_v52  ;;  %v423_v62 = vsel %vm4785_vm12, %v419_v59, %v421_v58  ;;  %v424_v63 = vsel %vm4786_vm0, %v417_v51, %v419_v59  ;;  %vm4787_vm4 = vcmask 64512   ;;  %v3385_v59 = vld [vmem:[%s4714_s1 + $0x30] sm:$0xff] }
  0x8a   :  { %3363 = vmatpush1.msk.msra.mxu0 %vm3967_vm1, %v426_v61  ;;  %3365 = vmatprep.subr.msk.mxu1 %vm3975_vm14, %v423_v62  ;;  %vm4788_vm12 = vmmov %vm4787_vm4  ;;  %vm4738_vm14 = vcmp.lt.s32.totalorder %v3811_v6, 113 }
  0x8b   :  { %3366 = vmatpush1.msk.msra.mxu1 %vm3983_vm13, %v424_v63  ;;  %vm4789_vm0 = vmmov %vm4787_vm4  ;;  %vm4735_vm13 = vcmp.lt.s32.totalorder %v3825_v15, 15 }
  0x8c   :  { %v593_v7 = vpop.permute.xlu1 %592  ;;  %3364 = vmatmul.mubr.msk.f32.vlgmr.msra.gmra.mrb[0].mxu0 %vm4787_vm4, %v3361_v5  ;;  %3367 = vmatmul.mubr.msk.f32.vlgmr.msra.gmra.mrb[0].mxu1 %vm4788_vm12, %v3361_v5  ;;  %v591_v8 = vpop.permute.xlu0 %590  ;;  %vm4790_vm4 = vmmov %vm4789_vm0  ;;  %vm4732_vm12 = vcmp.lt.s32.totalorder %v3811_v6, 127 }
  0x8d   :  { %v601_v9 = vsel %vm4730_vm7, %v591_v8, %v593_v7  ;;  %684 = vmatprep.mubr.f32.mxu0 %v3691_v2  ;;  %755 = vmatprep.mubr.f32.mxu1 %v3691_v2 }
  0x8e   :  { %3369 = vmatprep.subr.msk.mxu0 %vm3838_vm6, %v601_v9 }
  0x90   :  { %v597_v10 = vpop.permute.xlu1 %596  ;;  %v595_v11 = vpop.permute.xlu0 %594 }
  0x91   :  { %v602_v12 = vsel %vm4730_vm7, %v597_v10, %v591_v8  ;;  %v599_v13 = vsel %vm4730_vm7, %v595_v11, %v597_v10  ;;  %v600_v16 = vsel %vm4730_vm7, %v593_v7, %v595_v11  ;;  %vm4791_vm7 = vmmov %vm4790_vm4  ;;  %v4810_v7 = vmov 0 }
  0x92   :  { %3370 = vmatpush1.msk.msra.mxu0 %vm3871_vm9, %v602_v12  ;;  %3372 = vmatprep.subr.msk.mxu1 %vm3877_vm10, %v599_v13  ;;  %v4813_v8 = vmov 0  ;;  %v3392_v13 = vld [vmem:[%s4714_s1 + $0x38] sm:$0xff] }
  0x93   :  { %3373 = vmatpush1.msk.msra.mxu1 %vm3884_vm11, %v600_v16  ;;  %771 = vmatprep.subr.mxu0 %v3749_v4  ;;  %v4816_v16 = vmov 0 }
  0x94   :  { %3371 = vmatmul.mubr.msk.f32.vlgmr.msra.gmra.mrb[0].mxu0 %vm4789_vm0, %v3368_v17  ;;  %3374 = vmatmul.mubr.msk.f32.vlgmr.msra.gmra.mrb[0].mxu1 %vm4790_vm4, %v3368_v17  ;;  %v918_v20 = vpop.permute.xlu0 %917  ;;  %v920_v21 = vpop.permute.xlu1 %919  ;;  %vm4734_vm0 = vcmp.lt.s32.totalorder %v3823_v14, 15 }
  0x95   :  { %842 = vmatprep.subr.mxu1 %v3744_v3  ;;  %772 = vmatpush1.msra.mxu0 %v3733_v1  ;;  %v3375_v1 = vld [vmem:[%s4714_s1 + $0x20] sm:$0xff]  ;;  %v928_v3 = vsel %vm4732_vm12, %v918_v20, %v920_v21 }
  0x96   :  { %835 = vmatprep.mubr.f32.mxu0 %v3691_v2  ;;  %843 = vmatpush1.msra.mxu1 %v3728_v0 }
  0x97   :  { %906 = vmatprep.mubr.f32.mxu1 %v3691_v2 }
  0x98   :  { %v922_v22 = vpop.permute.xlu0 %921  ;;  %v924_v4 = vpop.permute.xlu1 %923 }
  0x99   :  { %v927_v23 = vsel %vm4732_vm12, %v920_v21, %v922_v22  ;;  %v929_v24 = vsel %vm4732_vm12, %v924_v4, %v918_v20  ;;  %v926_v0 = vsel %vm4732_vm12, %v922_v22, %v924_v4  ;;  %vm4075_vm12 = vmand %vm4735_vm13, %vm3877_vm10  ;;  %vm4801_vm10 = vcmask 64512   ;;  %v3399_v22 = vld [vmem:[%s4714_s1 + $0x40] sm:$0xff] }
  0x9a   :  { %3379 = vmatprep.subr.msk.mxu0 %vm3915_vm15, %v927_v23  ;;  %3382 = vmatprep.subr.msk.mxu1 %vm3949_vm3, %v929_v24  ;;  %v4795_v29 = vsel %vm4075_vm12, 4294967295, %v4794_v29  ;;  %v4819_v21 = vmov 0 }
  0x9c   :  { %3376 = vmatmul.mubr.msk.f32.vlgmr.msra.gmra.mrb[0].mxu0 %vm4790_vm4, %v3375_v1  ;;  %3377 = vmatmul.mubr.msk.f32.vlgmr.msra.gmra.mrb[0].mxu1 %vm4791_vm7, %v3375_v1  ;;  %v1094_v26 = vpop.permute.xlu0 %1093  ;;  %v1096_v27 = vpop.permute.xlu1 %1095  ;;  %vm4066_vm7 = vmand %vm4734_vm0, %vm3838_vm6  ;;  %vm4739_vm4 = vcmp.lt.s32.totalorder %v3829_v19, 15  ;;  %vm4796_vm0 = vcmp.lt.s32.totalorder %v3827_v18, 15 }
  0x9d   :  { %3380 = vmatpush1.msk.msra.mxu0 %vm3943_vm5, %v928_v3  ;;  %3383 = vmatpush1.msk.msra.mxu1 %vm3956_vm2, %v926_v0  ;;  %v4793_v28 = vsel %vm4066_vm7, 4294967295, %v4792_v28  ;;  %vm4090_vm13 = vmand %vm4796_vm0, %vm3871_vm9  ;;  %v1104_v42 = vsel %vm4738_vm14, %v1094_v26, %v1096_v27 }
  0x9e   :  { %1011 = vmatprep.mubr.f32.mxu0 %v3691_v2  ;;  %1082 = vmatprep.mubr.f32.mxu1 %v3691_v2  ;;  %v4798_v41 = vsel %vm4090_vm13, 4294967295, %v4797_v41  ;;  %vm4106_vm0 = vmand %vm4739_vm4, %vm3884_vm11  ;;  %vm4805_vm4 = vcmask 64512  }
  0x9f   :  { %v4800_v46 = vsel %vm4106_vm0, 4294967295, %v4799_v46  ;;  %vm4802_vm9 = vmmov %vm4801_vm10 }
  0xa0   :  { %v1098_v30 = vpop.permute.xlu0 %1097  ;;  %v1100_v31 = vpop.permute.xlu1 %1099 }
  0xa1   :  { %v1103_v34 = vsel %vm4738_vm14, %v1096_v27, %v1098_v30  ;;  %v1105_v35 = vsel %vm4738_vm14, %v1100_v31, %v1094_v26  ;;  %v1102_v45 = vsel %vm4738_vm14, %v1098_v30, %v1100_v31  ;;  %vm4743_vm14 = vcmp.lt.s32.totalorder %v3811_v6, 112 }
  0xa2   :  { %3386 = vmatprep.subr.msk.mxu0 %vm4066_vm7, %v1103_v34  ;;  %3389 = vmatprep.subr.msk.mxu1 %vm4075_vm12, %v1105_v35  ;;  %vm4808_vm12 = vcmp.lt.s32.totalorder %v3829_v19, 15 }
  0xa4   :  { %3381 = vmatmul.mubr.msk.f32.vlgmr.msra.gmra.mrb[0].mxu0 %vm4801_vm10, %v3378_v37  ;;  %3384 = vmatmul.mubr.msk.f32.vlgmr.msra.gmra.mrb[0].mxu1 %vm4802_vm9, %v3378_v37  ;;  %v1270_v47 = vpop.permute.xlu0 %1269  ;;  %v1272_v48 = vpop.permute.xlu1 %1271  ;;  %vm4803_vm9 = vcmp.lt.s32.totalorder %v3823_v14, 15  ;;  %vm4804_vm10 = vcmp.lt.s32.totalorder %v3825_v15, 15 }
  0xa5   :  { %3387 = vmatpush1.msk.msra.mxu0 %vm4090_vm13, %v1104_v42  ;;  %3390 = vmatpush1.msk.msra.mxu1 %vm4106_vm0, %v1102_v45  ;;  %v1280_v61 = vsel %vm4743_vm14, %v1270_v47, %v1272_v48  ;;  %vm4806_vm0 = vmmov %vm4805_vm4  ;;  %vm4807_vm13 = vcmp.lt.s32.totalorder %v3827_v18, 15  ;;  %v3406_v42 = vld [vmem:[%s4715_s2 + $0x8] sm:$0xff] }
  0xa6   :  { %1187 = vmatprep.mubr.f32.mxu0 %v3691_v2  ;;  %1258 = vmatprep.mubr.f32.mxu1 %v3691_v2 }
  0xa8   :  { %v1274_v51 = vpop.permute.xlu0 %1273  ;;  %v1276_v52 = vpop.permute.xlu1 %1275 }
  0xa9   :  { %v1279_v54 = vsel %vm4743_vm14, %v1272_v48, %v1274_v51  ;;  %v1281_v58 = vsel %vm4743_vm14, %v1276_v52, %v1270_v47  ;;  %v1278_v62 = vsel %vm4743_vm14, %v1274_v51, %v1276_v52  ;;  %vm4745_vm14 = vcmp.lt.s32.totalorder %v3811_v6, 111 }
  0xaa   :  { %3393 = vmatprep.subr.msk.mxu0 %vm4803_vm9, %v1279_v54  ;;  %3396 = vmatprep.subr.msk.mxu1 %vm4804_vm10, %v1281_v58 }
  0xac   :  { %3388 = vmatmul.mubr.msk.f32.vlgmr.msra.gmra.mrb[0].mxu0 %vm4805_vm4, %v3385_v59  ;;  %3391 = vmatmul.mubr.msk.f32.vlgmr.msra.gmra.mrb[0].mxu1 %vm4806_vm0, %v3385_v59  ;;  %v1446_v63 = vpop.permute.xlu0 %1445  ;;  %v1448_v5 = vpop.permute.xlu1 %1447  ;;  %vm4809_vm4 = vmmov %vm4803_vm9 }
  0xad   :  { %3394 = vmatpush1.msk.msra.mxu0 %vm4807_vm13, %v1280_v61  ;;  %3397 = vmatpush1.msk.msra.mxu1 %vm4808_vm12, %v1278_v62  ;;  %vm4147_vm9 = vmand %vm4809_vm4, %vm3915_vm15  ;;  %vm4815_vm12 = vcmp.lt.s32.totalorder %v3827_v18, 15  ;;  %v1456_v17 = vsel %vm4745_vm14, %v1446_v63, %v1448_v5  ;;  %vm4818_vm4 = vcmp.lt.s32.totalorder %v3829_v19, 15  ;;  %v1641_v61 = vld [vmem:[%s4715_s2] sm:$0xff] }
  0xae   :  { %1363 = vmatprep.mubr.f32.mxu0 %v3691_v2  ;;  %1434 = vmatprep.mubr.f32.mxu1 %v3691_v2  ;;  %v4811_v7 = vsel %vm4147_vm9, 4294967295, %v4810_v7  ;;  %vm4812_vm13 = vmmov %vm4804_vm10 }
  0xaf   :  { %vm4155_vm0 = vmand %vm4812_vm13, %vm3949_vm3 }
  0xb0   :  { %v4814_v8 = vsel %vm4155_vm0, 4294967295, %v4813_v8  ;;  %v1450_v9 = vpop.permute.xlu0 %1449  ;;  %v1452_v10 = vpop.permute.xlu1 %1451  ;;  %vm4170_vm10 = vmand %vm4815_vm12, %vm3943_vm5  ;;  %vm4821_vm12 = vcmask 64512  }
  0xb1   :  { %v1455_v11 = vsel %vm4745_vm14, %v1448_v5, %v1450_v9  ;;  %v1457_v12 = vsel %vm4745_vm14, %v1452_v10, %v1446_v63  ;;  %v4817_v16 = vsel %vm4170_vm10, 4294967295, %v4816_v16  ;;  %v1454_v20 = vsel %vm4745_vm14, %v1450_v9, %v1452_v10  ;;  %vm4186_vm13 = vmand %vm4818_vm4, %vm3956_vm2 }
  0xb2   :  { %3400 = vmatprep.subr.msk.mxu0 %vm4147_vm9, %v1455_v11  ;;  %3403 = vmatprep.subr.msk.mxu1 %vm4155_vm0, %v1457_v12  ;;  %v4820_v21 = vsel %vm4186_vm13, 4294967295, %v4819_v21  ;;  %vm4822_vm7 = vmmov %vm4821_vm12  ;;  %vm4833_vm0 = vcmp.ge.s32.totalorder %v3829_v19, 1 }
  0xb3   :  { %vm4823_vm4 = vmmov %vm4822_vm7 }
  0xb4   :  { %3395 = vmatmul.mubr.msk.f32.vlgmr.msra.gmra.mrb[0].mxu0 %vm4821_vm12, %v3392_v13  ;;  %3398 = vmatmul.mubr.msk.f32.vlgmr.msra.gmra.mrb[0].mxu1 %vm4822_vm7, %v3392_v13  ;;  %vm4824_vm14 = vmmov %vm4823_vm4  ;;  %vm4826_vm7 = vcmp.ge.s32.totalorder %v3823_v14, 1 }
  0xb5   :  { %3401 = vmatpush1.msk.msra.mxu0 %vm4170_vm10, %v1456_v17  ;;  %3404 = vmatpush1.msk.msra.mxu1 %vm4186_vm13, %v1454_v20  ;;  %vm4832_vm10 = vcmask 64512  }
  0xb6   :  { %1539 = vmatprep.mubr.f32.mxu0 %v3691_v2  ;;  %1610 = vmatprep.mubr.f32.mxu1 %v3691_v2  ;;  %vm4834_vm9 = vmmov %vm4832_vm10 }
  0xbc   :  { %3402 = vmatmul.mubr.msk.f32.vlgmr.msra.gmra.mrb[0].mxu0 %vm4823_vm4, %v3399_v22  ;;  %3405 = vmatmul.mubr.msk.f32.vlgmr.msra.gmra.mrb[0].mxu1 %vm4824_vm14, %v3399_v22  ;;  %vm4825_vm14 = vcmp.lt.s32.totalorder %v3811_v6, 16 }
  0xbd   :  { %1727 = vmatprep.mubr.f32.mxu0 %v3691_v2  ;;  %1798 = vmatprep.mubr.f32.mxu1 %v3691_v2  ;;  %vm4827_vm12 = vmmov %vm4825_vm14 }
  0xbe   :  { %vm4828_vm4 = vmmov %vm4827_vm12 }
  0xbf   :  { %vm4829_vm13 = vmmov %vm4828_vm4 }
 0x18f   :  { %v1541_v4 = vpop.f32.mrb[0].mxu0  ;;  %v1612_v23 = vpop.f32.mrb[0].mxu1 }
 0x190   :  { %v4205_v24 = vmax.f32 %v1541_v4, 0.0  ;;  %v1543_v1 = vpop.f32.mrb[1].mxu0  ;;  %v1614_v3 = vpop.f32.mrb[1].mxu1  ;;  %v4213_v26 = vmax.f32 %v1612_v23, 0.0 }
 0x191   :  { %v4207_v0 = vmax.f32 %v1543_v1, 0.0  ;;  %v4215_v27 = vmax.f32 %v1614_v3, 0.0  ;;  %v3433_v3 = vld [vmem:[%s4715_s2 + $0x20] sm:$0xff] }
 0x192   :  { %1642 = vrot.lane.b32.xlu0 %v4205_v24, %s3692_s19 }
 0x193   :  { %1644 = vrot.lane.b32.xlu1 %v4207_v0, %s3692_s19 }
 0x196   :  { %1646 = vrot.lane.b32.xlu0 %v4213_v26, %s3692_s19 }
 0x197   :  { %1648 = vrot.lane.b32.xlu1 %v4215_v27, %s3692_s19 }
 0x19a   :  { %1625 = vrot.lane.b32.xlu0 %v4205_v24, %s3693_s24 }
 0x19b   :  { %1627 = vrot.lane.b32.xlu1 %v4207_v0, %s3693_s24 }
 0x19e   :  { %1629 = vrot.lane.b32.xlu0 %v4213_v26, %s3693_s24 }
 0x19f   :  { %1631 = vrot.lane.b32.xlu1 %v4215_v27, %s3693_s24 }
 0x1a2   :  { %1950 = vrot.lane.b32.xlu0 %v4205_v24, %s3694_s0 }
 0x1a3   :  { %1952 = vrot.lane.b32.xlu1 %v4207_v0, %s3694_s0 }
 0x1a6   :  { %1954 = vrot.lane.b32.xlu0 %v4213_v26, %s3694_s0 }
 0x1a7   :  { %1956 = vrot.lane.b32.xlu1 %v4215_v27, %s3694_s0 }
 0x1aa   :  { %2117 = vrot.lane.b32.xlu0 %v4205_v24, %s3695_s25 }
 0x1ab   :  { %2119 = vrot.lane.b32.xlu1 %v4207_v0, %s3695_s25 }
 0x1ae   :  { %2121 = vrot.lane.b32.xlu0 %v4213_v26, %s3695_s25 }
 0x1af   :  { %2123 = vrot.lane.b32.xlu1 %v4215_v27, %s3695_s25 }
 0x1b2   :  { %2435 = vrot.lane.b32.xlu0 %v4205_v24, %s3696_s26 }
 0x1b3   :  { %2437 = vrot.lane.b32.xlu1 %v4207_v0, %s3696_s26 }
 0x1b6   :  { %2439 = vrot.lane.b32.xlu0 %v4213_v26, %s3696_s26 }
 0x1b7   :  { %2441 = vrot.lane.b32.xlu1 %v4215_v27, %s3696_s26 }
 0x1ba   :  { %2602 = vrot.lane.b32.xlu0 %v4205_v24, %s3697_s27 }
 0x1bb   :  { %2604 = vrot.lane.b32.xlu1 %v4207_v0, %s3697_s27 }
 0x1be   :  { %2606 = vrot.lane.b32.xlu0 %v4213_v26, %s3697_s27 }
 0x1bf   :  { %2608 = vrot.lane.b32.xlu1 %v4215_v27, %s3697_s27 }
 0x1c2   :  { %2769 = vrot.lane.b32.xlu0 %v4205_v24, %s3698_s28 }
 0x1c3   :  { %2771 = vrot.lane.b32.xlu1 %v4207_v0, %s3698_s28 }
 0x1c6   :  { %2773 = vrot.lane.b32.xlu0 %v4213_v26, %s3698_s28 }
 0x1c7   :  { %2775 = vrot.lane.b32.xlu1 %v4215_v27, %s3698_s28 }
 0x1ca   :  { %2936 = vrot.lane.b32.xlu0 %v4205_v24, %s3699_s29 }
 0x1cb   :  { %2938 = vrot.lane.b32.xlu1 %v4207_v0, %s3699_s29 }
 0x1ce   :  { %2940 = vrot.lane.b32.xlu0 %v4213_v26, %s3699_s29 }
 0x1cf   :  { %2942 = vrot.lane.b32.xlu1 %v4215_v27, %s3699_s29 }
 0x204   :  { %v1643_v30 = vpop.permute.xlu0 %1642 }
 0x205   :  { %v1645_v31 = vpop.permute.xlu1 %1644 }
 0x206   :  { %v1652_v34 = vsel %vm4825_vm14, %v1643_v30, %v1645_v31  ;;  %vm4830_vm14 = vcmp.ge.s32.totalorder %v3827_v18, 1 }
 0x207   :  { %3407 = vmatprep.subr.msk.mxu0 %vm4826_vm7, %v1652_v34  ;;  %vm4831_vm7 = vcmp.ge.s32.totalorder %v3825_v15, 1 }
 0x208   :  { %v1647_v35 = vpop.permute.xlu0 %1646 }
 0x209   :  { %v1649_v37 = vpop.permute.xlu1 %1648  ;;  %v1651_v48 = vsel %vm4829_vm13, %v1645_v31, %v1647_v35  ;;  %vm4839_vm13 = vnez %v4761_v39 }
 0x20a   :  { %v1650_v45 = vsel %vm4827_vm12, %v1647_v35, %v1649_v37  ;;  %v1653_v47 = vsel %vm4828_vm4, %v1649_v37, %v1643_v30  ;;  %vm4835_vm12 = vcmp.lt.s32.totalorder %v3811_v6, 17  ;;  %vm4841_vm4 = vcmask 64512  }
 0x20b   :  { %3408 = vmatpush1.msk.msra.mxu0 %vm4830_vm14, %v1653_v47  ;;  %3410 = vmatprep.subr.msk.mxu1 %vm4831_vm7, %v1650_v45  ;;  %vm4842_vm14 = vnez %v4765_v43  ;;  %vm4843_vm7 = vmmov %vm4841_vm4  ;;  %v3419_v43 = vld [vmem:[%s4715_s2 + $0x10] sm:$0xff] }
 0x20c   :  { %v1626_v51 = vpop.permute.xlu0 %1625  ;;  %3409 = vmatmul.mubr.msk.f32.vlgmr.msra.gmra.mrb[2].mxu0 %vm4832_vm10, %v3406_v42  ;;  %3411 = vmatpush1.msk.msra.mxu1 %vm4833_vm0, %v1651_v48  ;;  %vm4836_vm0 = vmmov %vm4835_vm12 }
 0x20d   :  { %3412 = vmatmul.mubr.msk.f32.vlgmr.msra.gmra.mrb[2].mxu1 %vm4834_vm9, %v3406_v42  ;;  %v1628_v52 = vpop.permute.xlu1 %1627  ;;  %1872 = vmatprep.mubr.f32.mxu0 %v3691_v2  ;;  %vm4837_vm9 = vmmov %vm4836_vm0 }
 0x20e   :  { %v1635_v54 = vsel %vm4835_vm12, %v1626_v51, %v1628_v52  ;;  %1943 = vmatprep.mubr.f32.mxu1 %v3691_v2  ;;  %vm4838_vm10 = vmmov %vm4836_vm0  ;;  %vm4844_vm12 = vcmp.lt.s32.totalorder %v3811_v6, 15 }
 0x20f   :  { %3413 = vmatprep.subr.msk.mxu0 %vm3867_vm8, %v1635_v54  ;;  %vm4840_vm8 = vnez %v4763_v40 }
 0x210   :  { %v1630_v58 = vpop.permute.xlu0 %1629 }
 0x211   :  { %v1632_v59 = vpop.permute.xlu1 %1631  ;;  %v1634_v5 = vsel %vm4838_vm10, %v1628_v52, %v1630_v58 }
 0x212   :  { %v1633_v62 = vsel %vm4836_vm0, %v1630_v58, %v1632_v59  ;;  %v1636_v63 = vsel %vm4837_vm9, %v1632_v59, %v1626_v51  ;;  %vm4845_vm0 = vnez %v4769_v49  ;;  %vm4846_vm9 = vmmov %vm4844_vm12 }
 0x213   :  { %3414 = vmatpush1.msk.msra.mxu0 %vm4839_vm13, %v1636_v63  ;;  %3416 = vmatprep.subr.msk.mxu1 %vm4840_vm8, %v1633_v62  ;;  %vm4847_vm10 = vmmov %vm4846_vm9  ;;  %vm4849_vm8 = vnez %v4780_v57 }
 0x214   :  { %v1951_v32 = vpop.permute.xlu0 %1950  ;;  %3415 = vmatmul.mubr.msk.f32.vlgmr.msra.gmra.mrb[2].mxu0 %vm4841_vm4, %v1641_v61  ;;  %3417 = vmatpush1.msk.msra.mxu1 %vm4842_vm14, %v1634_v5  ;;  %vm4848_vm13 = vmmov %vm4846_vm9  ;;  %vm4850_vm14 = vnez %v4783_v60  ;;  %v3426_v60 = vld [vmem:[%s4715_s2 + $0x18] sm:$0xff]  ;;  %v3155_v5 = vld [vmem:[%s4716_s3 + $0x80] sm:$0xff] }
 0x215   :  { %3418 = vmatmul.mubr.msk.f32.vlgmr.msra.gmra.mrb[2].mxu1 %vm4843_vm7, %v1641_v61  ;;  %v1953_v9 = vpop.permute.xlu1 %1952  ;;  %2035 = vmatprep.mubr.f32.mxu0 %v3691_v2  ;;  %vm4851_vm7 = vmmov %vm4841_vm4 }
 0x216   :  { %v1960_v10 = vsel %vm4844_vm12, %v1951_v32, %v1953_v9  ;;  %2106 = vmatprep.mubr.f32.mxu1 %v3691_v2  ;;  %vm4852_vm12 = vcmp.lt.s32.totalorder %v3811_v6, 1 }
 0x217   :  { %3420 = vmatprep.subr.msk.mxu0 %vm4845_vm0, %v1960_v10 }
 0x218   :  { %v1955_v39 = vpop.permute.xlu0 %1954 }
 0x219   :  { %v1957_v40 = vpop.permute.xlu1 %1956  ;;  %v1959_v13 = vsel %vm4848_vm13, %v1953_v9, %v1955_v39  ;;  %vm4858_vm13 = vmmov %vm4841_vm4  ;;  %v3187_v9 = vld [vmem:[%s4716_s3 + $0x180] sm:$0xff] }
 0x21a   :  { %v1958_v11 = vsel %vm4846_vm9, %v1955_v39, %v1957_v40  ;;  %v1961_v12 = vsel %vm4847_vm10, %v1957_v40, %v1951_v32  ;;  %vm4856_vm10 = vnez %v4755_v33  ;;  %v3156_v32 = vld [vmem:[%s4716_s3 + $0x88] sm:$0xff] }
 0x21b   :  { %3421 = vmatpush1.msk.msra.mxu0 %vm3967_vm1, %v1961_v12  ;;  %3423 = vmatprep.subr.msk.mxu1 %vm4849_vm8, %v1958_v11  ;;  %vm4853_vm1 = vmmov %vm4852_vm12  ;;  %v3534_v39 = vpack.c.bf16 %v3156_v32, %v3155_v5  ;;  %v3188_v40 = vld [vmem:[%s4716_s3 + $0x188] sm:$0xff]  ;;  %v3147_v5 = vld [vmem:[%s4716_s3 + $0x40] sm:$0xff] }
 0x21c   :  { %v2118_v49 = vpop.permute.xlu0 %2117  ;;  %3422 = vmatmul.mubr.msk.f32.vlgmr.msra.gmra.mrb[2].mxu0 %vm4841_vm4, %v3419_v43  ;;  %3424 = vmatpush1.msk.msra.mxu1 %vm4850_vm14, %v1959_v13  ;;  %vm4854_vm0 = vmmov %vm4853_vm1  ;;  %v3140_v11 = vld [vmem:[%s4716_s3 + $0x8] sm:$0xff]  ;;  %v3566_v13 = vpack.c.bf16 %v3188_v40, %v3187_v9  ;;  %v3179_v9 = vld [vmem:[%s4716_s3 + $0x140] sm:$0xff] }
 0x21d   :  { %3425 = vmatmul.mubr.msk.f32.vlgmr.msra.gmra.mrb[2].mxu1 %vm4851_vm7, %v3419_v43  ;;  %v2120_v17 = vpop.permute.xlu1 %2119  ;;  %2202 = vmatprep.mubr.f32.mxu0 %v3691_v2  ;;  %vm4855_vm9 = vmmov %vm4854_vm0  ;;  %v3139_v43 = vld [vmem:[%s4716_s3] sm:$0xff]  ;;  %v3148_v32 = vld [vmem:[%s4716_s3 + $0x48] sm:$0xff] }
 0x21e   :  { %v2127_v20 = vsel %vm4852_vm12, %v2118_v49, %v2120_v17  ;;  %2273 = vmatprep.mubr.f32.mxu1 %v3691_v2  ;;  %vm4859_vm8 = vmmov %vm4841_vm4  ;;  %vm4860_vm4 = vcmp.lt.s32.totalorder %v3811_v6, 127  ;;  %v3180_v40 = vld [vmem:[%s4716_s3 + $0x148] sm:$0xff] }
 0x21f   :  { %3427 = vmatprep.subr.msk.mxu0 %vm3838_vm6, %v2127_v20  ;;  %vm4857_vm6 = vnez %v4757_v36  ;;  %vm4862_vm14 = vmmov %vm4860_vm4  ;;  %v3172_v20 = vld [vmem:[%s4716_s3 + $0x108] sm:$0xff] }
 0x220   :  { %v2122_v56 = vpop.permute.xlu0 %2121  ;;  %vm4863_vm12 = vmmov %vm4860_vm4 }
 0x221   :  { %v2124_v57 = vpop.permute.xlu1 %2123  ;;  %v2126_v23 = vsel %vm4855_vm9, %v2120_v17, %v2122_v56  ;;  %v3171_v17 = vld [vmem:[%s4716_s3 + $0x100] sm:$0xff] }
 0x222   :  { %v2125_v22 = vsel %vm4853_vm1, %v2122_v56, %v2124_v57  ;;  %v2128_v4 = vsel %vm4854_vm0, %v2124_v57, %v2118_v49  ;;  %vm4864_vm1 = vmmov %vm4851_vm7  ;;  %v3536_v49 = vpack.c.bf16 %v3140_v11, %v3139_v43  ;;  %v3157_v56 = vld [vmem:[%s4716_s3 + $0x90] sm:$0xff]  ;;  %v3166_v11 = vld [vmem:[%s4716_s3 + $0xd8] sm:$0xff] }
 0x223   :  { %3428 = vmatpush1.msk.msra.mxu0 %vm4856_vm10, %v2128_v4  ;;  %3430 = vmatprep.subr.msk.mxu1 %vm4857_vm6, %v2125_v22  ;;  %vm4870_vm9 = vmmov %vm4864_vm1  ;;  %vm4872_vm6 = vnez %v4798_v41  ;;  %v3443_v41 = vld [vmem:[%s4715_s2 + $0x30] sm:$0xff]  ;;  %v3158_v22 = vld [vmem:[%s4716_s3 + $0x98] sm:$0xff] }
 0x224   :  { %v2436_v25 = vpop.permute.xlu0 %2435  ;;  %3429 = vmatmul.mubr.msk.f32.vlgmr.msra.gmra.mrb[2].mxu0 %vm4858_vm13, %v3426_v60  ;;  %3431 = vmatpush1.msk.msra.mxu1 %vm3884_vm11, %v2126_v23  ;;  %vm4861_vm11 = vmmov %vm4860_vm4  ;;  %v3189_v4 = vld [vmem:[%s4716_s3 + $0x190] sm:$0xff]  ;;  %v3190_v23 = vld [vmem:[%s4716_s3 + $0x198] sm:$0xff] }
 0x225   :  { %2289 = vmatprep.subr.mxu0 %v4207_v0  ;;  %3432 = vmatmul.mubr.msk.f32.vlgmr.msra.gmra.mrb[2].mxu1 %vm4859_vm8, %v3426_v60  ;;  %v2438_v1 = vpop.permute.xlu1 %2437  ;;  %vm4873_vm13 = vmmov %vm4864_vm1  ;;  %vm4874_vm8 = vnez %v4800_v46  ;;  %v3568_v60 = vpack.c.bf16 %v3172_v20, %v3171_v17  ;;  %v3165_v43 = vld [vmem:[%s4716_s3 + $0xd0] sm:$0xff]  ;;  %v3584_v17 = vpack.c.bf16 %v3180_v40, %v3179_v9 }
 0x226   :  { %2290 = vmatpush1.msra.mxu0 %v4205_v24  ;;  %2360 = vmatprep.subr.mxu1 %v4215_v27  ;;  %v2445_v0 = vsel %vm4862_vm14, %v2436_v25, %v2438_v1  ;;  %vm4877_vm14 = vcmp.lt.s32.totalorder %v3823_v14, 15  ;;  %v3554_v20 = vpack.c.bf16 %v3166_v11, %v3165_v43 }
 0x227   :  { %2361 = vmatpush1.msra.mxu1 %v4213_v26  ;;  %2353 = vmatprep.mubr.f32.mxu0 %v3691_v2 }
 0x228   :  { %v2440_v33 = vpop.permute.xlu0 %2439  ;;  %2424 = vmatprep.mubr.f32.mxu1 %v3691_v2 }
 0x229   :  { %v2444_v36 = vsel %vm4860_vm4, %v2438_v1, %v2440_v33  ;;  %v2442_v38 = vpop.permute.xlu1 %2441  ;;  %vm4875_vm4 = vcmp.lt.s32.totalorder %v3811_v6, 112  ;;  %v3570_v1 = vpack.c.bf16 %v3190_v23, %v3189_v4  ;;  %v3182_v4 = vld [vmem:[%s4716_s3 + $0x158] sm:$0xff]  ;;  %v3167_v23 = vld [vmem:[%s4716_s3 + $0xe0] sm:$0xff] }
 0x22a   :  { %v2446_v24 = vsel %vm4861_vm11, %v2442_v38, %v2436_v25  ;;  %3437 = vmatprep.subr.msk.mxu0 %vm3915_vm15, %v2444_v36  ;;  %v2443_v27 = vsel %vm4863_vm12, %v2440_v33, %v2442_v38  ;;  %vm4867_vm15 = vnez %v4793_v28  ;;  %vm4876_vm11 = vmmov %vm4875_vm4  ;;  %v3538_v25 = vpack.c.bf16 %v3158_v22, %v3157_v56  ;;  %v3141_v33 = vld [vmem:[%s4716_s3 + $0x10] sm:$0xff]  ;;  %v3142_v36 = vld [vmem:[%s4716_s3 + $0x18] sm:$0xff] }
 0x22b   :  { %3440 = vmatprep.subr.msk.mxu1 %vm3949_vm3, %v2446_v24  ;;  %vm4865_vm3 = vcmp.lt.s32.totalorder %v3811_v6, 113  ;;  %vm4879_vm12 = vmmov %vm4875_vm4  ;;  %v3173_v38 = vld [vmem:[%s4716_s3 + $0x110] sm:$0xff]  ;;  %v3174_v24 = vld [vmem:[%s4716_s3 + $0x118] sm:$0xff] }
 0x22c   :  { %v2603_v26 = vpop.permute.xlu0 %2602  ;;  %3434 = vmatmul.mubr.msk.f32.vlgmr.msra.gmra.mrb[2].mxu0 %vm4851_vm7, %v3433_v3  ;;  %vm4869_vm0 = vmmov %vm4865_vm3  ;;  %vm4878_vm7 = vcmp.lt.s32.totalorder %v3825_v15, 15  ;;  %v3149_v56 = vld [vmem:[%s4716_s3 + $0x50] sm:$0xff] }
 0x22d   :  { %3438 = vmatpush1.msk.msra.mxu0 %vm3943_vm5, %v2445_v0  ;;  %3435 = vmatmul.mubr.msk.f32.vlgmr.msra.gmra.mrb[2].mxu1 %vm4864_vm1, %v3433_v3  ;;  %v2605_v30 = vpop.permute.xlu1 %2604  ;;  %vm4866_vm5 = vmmov %vm4865_vm3  ;;  %v3540_v3 = vpack.c.bf16 %v3142_v36, %v3141_v33  ;;  %v3159_v0 = vld [vmem:[%s4716_s3 + $0xa0] sm:$0xff]  ;;  %v3200_v33 = vld [vmem:[%s4716_s3 + $0x1e8] sm:$0xff] }
 0x22e   :  { %3441 = vmatpush1.msk.msra.mxu1 %vm3956_vm2, %v2443_v27  ;;  %2520 = vmatprep.mubr.f32.mxu0 %v3691_v2  ;;  %vm4868_vm2 = vnez %v4795_v29  ;;  %v2612_v55 = vsel %vm4869_vm0, %v2603_v26, %v2605_v30  ;;  %vm4871_vm10 = vmmov %vm4869_vm0  ;;  %vm4884_vm0 = vcmp.lt.s32.totalorder %v3811_v6, 111  ;;  %v3572_v27 = vpack.c.bf16 %v3174_v24, %v3173_v38  ;;  %v3151_v24 = vld [vmem:[%s4716_s3 + $0x60] sm:$0xff] }
 0x22f   :  { %2591 = vmatprep.mubr.f32.mxu1 %v3691_v2 }
 0x230   :  { %v2607_v44 = vpop.permute.xlu0 %2606 }
 0x231   :  { %v2611_v53 = vsel %vm4865_vm3, %v2605_v30, %v2607_v44  ;;  %v2609_v31 = vpop.permute.xlu1 %2608  ;;  %vm4880_vm3 = vmmov %vm4875_vm4 }
 0x232   :  { %v2613_v34 = vsel %vm4866_vm5, %v2609_v31, %v2603_v26  ;;  %3444 = vmatprep.subr.msk.mxu0 %vm4867_vm15, %v2611_v53  ;;  %v2610_v37 = vsel %vm4871_vm10, %v2607_v44, %v2609_v31  ;;  %vm4881_vm5 = vcmp.lt.s32.totalorder %v3827_v18, 15  ;;  %vm4882_vm15 = vmmov %vm4864_vm1  ;;  %v3450_v18 = vld [vmem:[%s4715_s2 + $0x38] sm:$0xff]  ;;  %vm4886_vm10 = vnez %v4811_v7  ;;  %v3457_v7 = vld [vmem:[%s4715_s2 + $0x40] sm:$0xff] }
 0x233   :  { %3447 = vmatprep.subr.msk.mxu1 %vm4868_vm2, %v2613_v34  ;;  %vm4883_vm2 = vcmp.lt.s32.totalorder %v3829_v19, 15  ;;  %v3160_v26 = vld [vmem:[%s4716_s3 + $0xa8] sm:$0xff]  ;;  %v3191_v44 = vld [vmem:[%s4716_s3 + $0x1a0] sm:$0xff] }
 0x234   :  { %v2770_v35 = vpop.permute.xlu0 %2769  ;;  %3439 = vmatmul.mubr.msk.f32.vlgmr.msra.gmra.mrb[2].mxu0 %vm4870_vm9, %v3436_v50  ;;  %vm4885_vm9 = vmmov %vm4884_vm0  ;;  %v3542_v30 = vpack.c.bf16 %v3160_v26, %v3159_v0  ;;  %v3192_v53 = vld [vmem:[%s4716_s3 + $0x1a8] sm:$0xff]  ;;  %v3143_v31 = vld [vmem:[%s4716_s3 + $0x20] sm:$0xff] }
 0x235   :  { %3445 = vmatpush1.msk.msra.mxu0 %vm4872_vm6, %v2612_v55  ;;  %3442 = vmatmul.mubr.msk.f32.vlgmr.msra.gmra.mrb[2].mxu1 %vm4873_vm13, %v3436_v50  ;;  %v2772_v42 = vpop.permute.xlu1 %2771  ;;  %vm4887_vm6 = vnez %v4814_v8  ;;  %vm4888_vm13 = vmmov %vm4884_vm0  ;;  %v3574_v50 = vpack.c.bf16 %v3192_v53, %v3191_v44  ;;  %v3144_v34 = vld [vmem:[%s4716_s3 + $0x28] sm:$0xff]  ;;  %v3175_v55 = vld [vmem:[%s4716_s3 + $0x120] sm:$0xff] }
 0x236   :  { %3448 = vmatpush1.msk.msra.mxu1 %vm4874_vm8, %v2610_v37  ;;  %2687 = vmatprep.mubr.f32.mxu0 %v3691_v2  ;;  %v2779_v46 = vsel %vm4879_vm12, %v2770_v35, %v2772_v42  ;;  %vm4889_vm8 = vmmov %vm4864_vm1  ;;  %v3161_v37 = vld [vmem:[%s4716_s3 + $0xb0] sm:$0xff]  ;;  %v3152_v0 = vld [vmem:[%s4716_s3 + $0x68] sm:$0xff] }
 0x237   :  { %2758 = vmatprep.mubr.f32.mxu1 %v3691_v2  ;;  %vm4894_vm12 = vmmov %vm4864_vm1  ;;  %v3560_v44 = vpack.c.bf16 %v3152_v0, %v3151_v24 }
 0x238   :  { %v2774_v28 = vpop.permute.xlu0 %2773 }
 0x239   :  { %v2778_v29 = vsel %vm4875_vm4, %v2772_v42, %v2774_v28  ;;  %v2776_v45 = vpop.permute.xlu1 %2775  ;;  %vm4890_vm4 = vmmov %vm4884_vm0  ;;  %v3162_v42 = vld [vmem:[%s4716_s3 + $0xb8] sm:$0xff] }
 0x23a   :  { %v2780_v47 = vsel %vm4876_vm11, %v2776_v45, %v2770_v35  ;;  %3451 = vmatprep.subr.msk.mxu0 %vm4877_vm14, %v2778_v29  ;;  %v2777_v51 = vsel %vm4880_vm3, %v2774_v28, %v2776_v45  ;;  %vm4891_vm11 = vnez %v4817_v16  ;;  %vm4892_vm14 = vmmov %vm4864_vm1  ;;  %v3176_v35 = vld [vmem:[%s4716_s3 + $0x128] sm:$0xff]  ;;  %v3193_v28 = vld [vmem:[%s4716_s3 + $0x1b0] sm:$0xff]  ;;  %v3544_v29 = vpack.c.bf16 %v3144_v34, %v3143_v31 }
 0x23b   :  { %3454 = vmatprep.subr.msk.mxu1 %vm4878_vm7, %v2780_v47  ;;  %vm4893_vm7 = vnez %v4820_v21  ;;  %v3194_v45 = vld [vmem:[%s4716_s3 + $0x1b8] sm:$0xff]  ;;  %v3546_v47 = vpack.c.bf16 %v3162_v42, %v3161_v37  ;;  %v3169_v31 = vld [vmem:[%s4716_s3 + $0xf0] sm:$0xff]  ;;  %vm4895_vm3 = vcmp.lt.s32.totalorder %v3811_v6, 127 }
 0x23c   :  { %v2937_v48 = vpop.permute.xlu0 %2936  ;;  %3446 = vmatmul.mubr.msk.f32.vlgmr.msra.gmra.mrb[2].mxu0 %vm4864_vm1, %v3443_v41  ;;  %v3201_v34 = vld [vmem:[%s4716_s3 + $0x1f0] sm:$0xff]  ;;  %v3154_v42 = vld [vmem:[%s4716_s3 + $0x78] sm:$0xff] }
 0x23d   :  { %3452 = vmatpush1.msk.msra.mxu0 %vm4881_vm5, %v2779_v46  ;;  %3449 = vmatmul.mubr.msk.f32.vlgmr.msra.gmra.mrb[2].mxu1 %vm4882_vm15, %v3443_v41  ;;  %v2939_v52 = vpop.permute.xlu1 %2938  ;;  %v3576_v41 = vpack.c.bf16 %v3176_v35, %v3175_v55  ;;  %v3145_v46 = vld [vmem:[%s4716_s3 + $0x30] sm:$0xff]  ;;  %v3202_v35 = vld [vmem:[%s4716_s3 + $0x1f8] sm:$0xff]  ;;  %vm4896_vm5 = vmmov %vm4895_vm3 }
 0x23e   :  { %3455 = vmatpush1.msk.msra.mxu1 %vm4883_vm2, %v2777_v51  ;;  %2854 = vmatprep.mubr.f32.mxu0 %v3691_v2  ;;  %v2946_v19 = vsel %vm4888_vm13, %v2937_v48, %v2939_v52  ;;  %v3177_v51 = vld [vmem:[%s4716_s3 + $0x130] sm:$0xff]  ;;  %vm4897_vm15 = vmmov %vm4895_vm3 }
 0x23f   :  { %2925 = vmatprep.mubr.f32.mxu1 %v3691_v2  ;;  %v3153_v37 = vld [vmem:[%s4716_s3 + $0x70] sm:$0xff]  ;;  %vm4898_vm2 = vmmov %vm4895_vm3 }
 0x240   :  { %v2941_v14 = vpop.permute.xlu0 %2940 }
 0x241   :  { %v2945_v15 = vsel %vm4884_vm0, %v2939_v52, %v2941_v14  ;;  %v2943_v54 = vpop.permute.xlu1 %2942  ;;  %v3578_v52 = vpack.c.bf16 %v3194_v45, %v3193_v28  ;;  %v3594_v28 = vpack.c.bf16 %v3202_v35, %v3201_v34  ;;  %v3185_v45 = vld [vmem:[%s4716_s3 + $0x170] sm:$0xff]  ;;  %vm4899_vm0 = vcmp.lt.s32.totalorder %v3811_v6, 112 }
 0x242   :  { %v2947_v58 = vsel %vm4885_vm9, %v2943_v54, %v2937_v48  ;;  %3458 = vmatprep.subr.msk.mxu0 %vm4886_vm10, %v2945_v15  ;;  %v2944_v59 = vsel %vm4890_vm4, %v2941_v14, %v2943_v54  ;;  %v3146_v48 = vld [vmem:[%s4716_s3 + $0x38] sm:$0xff]  ;;  %v3163_v15 = vld [vmem:[%s4716_s3 + $0xc0] sm:$0xff]  ;;  %v3164_v54 = vld [vmem:[%s4716_s3 + $0xc8] sm:$0xff] }
 0x243   :  { %3461 = vmatprep.subr.msk.mxu1 %vm4887_vm6, %v2947_v58  ;;  %v3178_v14 = vld [vmem:[%s4716_s3 + $0x138] sm:$0xff]  ;;  %v3196_v58 = vld [vmem:[%s4716_s3 + $0x1c8] sm:$0xff]  ;;  %vm4900_vm9 = vmmov %vm4899_vm0 }
 0x244   :  { %3453 = vmatmul.mubr.msk.f32.vlgmr.msra.gmra.mrb[2].mxu0 %vm4889_vm8, %v3450_v18  ;;  %vm4901_vm10 = vmmov %vm4899_vm0 }
 0x245   :  { %3459 = vmatpush1.msk.msra.mxu0 %vm4891_vm11, %v2946_v19  ;;  %3456 = vmatmul.mubr.msk.f32.vlgmr.msra.gmra.mrb[2].mxu1 %vm4892_vm14, %v3450_v18  ;;  %v3195_v18 = vld [vmem:[%s4716_s3 + $0x1c0] sm:$0xff]  ;;  %v3548_v19 = vpack.c.bf16 %v3146_v48, %v3145_v46  ;;  %vm4902_vm6 = vmmov %vm4899_vm0 }
 0x246   :  { %3462 = vmatpush1.msk.msra.mxu1 %vm4893_vm7, %v2944_v59  ;;  %3021 = vmatprep.mubr.f32.mxu0 %v3691_v2  ;;  %v3580_v59 = vpack.c.bf16 %v3178_v14, %v3177_v51 }
 0x247   :  { %3092 = vmatprep.mubr.f32.mxu1 %v3691_v2  ;;  %3535 = vmatprep.subr.bf16.mxu0 %v3534_v39  ;;  %v3582_v39 = vpack.c.bf16 %v3196_v58, %v3195_v18 }
 0x248   :  { %3567 = vmatprep.subr.bf16.mxu1 %v3566_v13  ;;  %v3198_v13 = vld [vmem:[%s4716_s3 + $0x1d8] sm:$0xff] }
 0x24c   :  { %3460 = vmatmul.mubr.msk.f32.vlgmr.msra.gmra.mrb[2].mxu0 %vm4894_vm12, %v3457_v7 }
 0x24d   :  { %3463 = vmatmul.mubr.msk.f32.vlgmr.msra.gmra.mrb[2].mxu1 %vm4864_vm1, %v3457_v7  ;;  %3537 = vmatpush3.bf16.msra.mxu0 %v3536_v49  ;;  %v3550_v7 = vpack.c.bf16 %v3164_v54, %v3163_v15  ;;  %v3552_v49 = vpack.c.bf16 %v3148_v32, %v3147_v5 }
 0x24e   :  { %3569 = vmatpush3.bf16.msra.mxu1 %v3568_v60  ;;  %3539 = vmatprep.subr.bf16.mxu0 %v3538_v25  ;;  %v3181_v60 = vld [vmem:[%s4716_s3 + $0x150] sm:$0xff]  ;;  %v3168_v25 = vld [vmem:[%s4716_s3 + $0xe8] sm:$0xff] }
 0x24f   :  { %3571 = vmatprep.subr.bf16.mxu1 %v3570_v1  ;;  %v3199_v1 = vld [vmem:[%s4716_s3 + $0x1e0] sm:$0xff]  ;;  %v3588_v38 = vpack.c.bf16 %v3182_v4, %v3181_v60 }
 0x250   :  { %v3590_v26 = vpack.c.bf16 %v3200_v33, %v3199_v1 }
 0x251   :  { %3541 = vmatpush3.bf16.msra.mxu0 %v3540_v3  ;;  %v3558_v3 = vpack.c.bf16 %v3168_v25, %v3167_v23 }
 0x252   :  { %3573 = vmatpush3.bf16.msra.mxu1 %v3572_v27  ;;  %3543 = vmatprep.subr.bf16.mxu0 %v3542_v30  ;;  %v3183_v27 = vld [vmem:[%s4716_s3 + $0x160] sm:$0xff]  ;;  %v3184_v30 = vld [vmem:[%s4716_s3 + $0x168] sm:$0xff] }
 0x253   :  { %3575 = vmatprep.subr.bf16.mxu1 %v3574_v50  ;;  %v3592_v53 = vpack.c.bf16 %v3184_v30, %v3183_v27  ;;  %v3170_v50 = vld [vmem:[%s4716_s3 + $0xf8] sm:$0xff] }
 0x254   :  { %v3562_v55 = vpack.c.bf16 %v3170_v50, %v3169_v31 }
 0x255   :  { %3545 = vmatpush3.bf16.msra.mxu0 %v3544_v29  ;;  %v3564_v29 = vpack.c.bf16 %v3154_v42, %v3153_v37 }
 0x256   :  { %3577 = vmatpush3.bf16.msra.mxu1 %v3576_v41  ;;  %3547 = vmatprep.subr.bf16.mxu0 %v3546_v47  ;;  %v3186_v41 = vld [vmem:[%s4716_s3 + $0x178] sm:$0xff] }
 0x257   :  { %3579 = vmatprep.subr.bf16.mxu1 %v3578_v52  ;;  %v3596_v47 = vpack.c.bf16 %v3186_v41, %v3185_v45 }
 0x259   :  { %3549 = vmatpush3.bf16.msra.mxu0 %v3548_v19 }
 0x25a   :  { %3581 = vmatpush3.bf16.msra.mxu1 %v3580_v59  ;;  %3551 = vmatprep.subr.bf16.mxu0 %v3550_v7 }
 0x25b   :  { %3583 = vmatprep.subr.bf16.mxu1 %v3582_v39 }
 0x25d   :  { %3553 = vmatpush3.bf16.msra.mxu0 %v3552_v49 }
 0x25e   :  { %3585 = vmatpush3.bf16.msra.mxu1 %v3584_v17  ;;  %3555 = vmatprep.subr.bf16.mxu0 %v3554_v20 }
 0x31f   :  { %v4470_v8 = vpop.f32.mrb[2].mxu0 }
 0x320   :  { %v3103_v16 = vmax.f32 %v4470_v8, 0.0  ;;  %v4473_v61 = vpop.f32.mrb[3].mxu0  ;;  %v4475_v21 = vpop.f32.mrb[2].mxu1 }
 0x321   :  { %v3104_v62 = vmax.f32 %v4473_v61, 0.0  ;;  %v3105_v2 = vmax.f32 %v4475_v21, 0.0  ;;  %v4479_v63 = vpop.f32.mrb[3].mxu1 }
 0x322   :  { %v3106_v10 = vmax.f32 %v4479_v63, 0.0 }
 0x323   :  { %v3671_v12 = vpack.i.bf16 %v3104_v62, %v3103_v16 }
 0x324   :  { %v3676_v57 = vpack.i.bf16 %v3106_v10, %v3105_v2 }
 0x325   :  { %3672 = vrot.lane.b32.xlu0 %v3671_v12, %s3696_s26  ;;  %v3197_v12 = vld [vmem:[%s4716_s3 + $0x1d0] sm:$0xff] }
 0x326   :  { %3677 = vrot.lane.b32.xlu1 %v3676_v57, %s3696_s26  ;;  %v3150_v57 = vld [vmem:[%s4716_s3 + $0x58] sm:$0xff]  ;;  %v3586_v22 = vpack.c.bf16 %v3198_v13, %v3197_v12 }
 0x327   :  { %v3556_v36 = vpack.c.bf16 %v3150_v57, %v3149_v56 }
 0x328   :  { %3587 = vmatprep.subr.bf16.mxu1 %v3586_v22 }
 0x329   :  { %3557 = vmatpush3.bf16.msra.mxu0 %v3556_v36  ;;  %3589 = vmatpush3.bf16.msra.mxu1 %v3588_v38 }
 0x32a   :  { %3559 = vmatprep.subr.bf16.mxu0 %v3558_v3  ;;  %3591 = vmatprep.subr.bf16.mxu1 %v3590_v26 }
 0x32d   :  { %3561 = vmatpush3.bf16.msra.mxu0 %v3560_v44  ;;  %3593 = vmatpush3.bf16.msra.mxu1 %v3592_v53 }
 0x32e   :  { %3563 = vmatprep.subr.bf16.mxu0 %v3562_v55  ;;  %3595 = vmatprep.subr.bf16.mxu1 %v3594_v28 }
 0x331   :  { %3565 = vmatpush3.bf16.msra.mxu0 %v3564_v29  ;;  %3597 = vmatpush3.bf16.msra.mxu1 %v3596_v47 }
 0x397   :  { %v3673_v46 = vpop.permute.xlu0 %3672 }
 0x398   :  { %v3675_v48 = vunpack.i.h.bf16 %v3673_v46  ;;  %v3674_v51 = vunpack.i.l.bf16 %v3673_v46  ;;  %v3678_v52 = vpop.permute.xlu1 %3677 }
 0x399   :  { %v3680_v14 = vunpack.i.h.bf16 %v3678_v52  ;;  %v3679_v15 = vunpack.i.l.bf16 %v3678_v52 }
 0x39a   :  { %v3117_v54 = vsel %vm4895_vm3, %v3674_v51, %v3675_v48 }
 0x39b   :  { %v3118_v18 = vsel %vm4896_vm5, %v3680_v14, %v3674_v51  ;;  %v3115_v58 = vsel %vm4897_vm15, %v3679_v15, %v3680_v14  ;;  %v3116_v19 = vsel %vm4898_vm2, %v3675_v48, %v3679_v15  ;;  %v3119_v59 = vmax.f32 %v3103_v16, %v3117_v54 }
 0x39c   :  { %v3120_v7 = vmax.f32 %v3104_v62, %v3116_v19  ;;  %v3121_v5 = vmax.f32 %v3105_v2, %v3115_v58  ;;  %v3122_v32 = vmax.f32 %v3106_v10, %v3118_v18 }
 0x39e   :  { %v3681_v9 = vpack.i.bf16 %v3120_v7, %v3119_v59  ;;  %v3686_v39 = vpack.i.bf16 %v3122_v32, %v3121_v5 }
 0x3a0   :  { %3682 = vrot.lane.b32.xlu0 %v3681_v9, %s3698_s28  ;;  %3687 = vrot.lane.b32.xlu1 %v3686_v39, %s3698_s28 }
 0x412   :  { %v3683_v40 = vpop.permute.xlu0 %3682  ;;  %v3688_v43 = vpop.permute.xlu1 %3687 }
 0x413   :  { %v3685_v11 = vunpack.i.h.bf16 %v3683_v40  ;;  %v3684_v8 = vunpack.i.l.bf16 %v3683_v40  ;;  %v3690_v16 = vunpack.i.h.bf16 %v3688_v43  ;;  %v3689_v12 = vunpack.i.l.bf16 %v3688_v43 }
 0x415   :  { %v3133_v61 = vsel %vm4899_vm0, %v3684_v8, %v3685_v11  ;;  %v3131_v21 = vsel %vm4900_vm9, %v3689_v12, %v3690_v16  ;;  %v3132_v62 = vsel %vm4901_vm10, %v3685_v11, %v3689_v12  ;;  %v3134_v2 = vsel %vm4902_vm6, %v3690_v16, %v3684_v8 }
 0x416   :  { %v3135_v63 = vmax.f32 %v3119_v59, %v3133_v61  ;;  %v3137_v10 = vmax.f32 %v3121_v5, %v3131_v21  ;;  %v3136_v13 = vmax.f32 %v3120_v7, %v3132_v62  ;;  %v3138_v49 = vmax.f32 %v3122_v32, %v3134_v2 }
 0x418   :  { %3267 = vmatprep.mubr.f32.mxu0 %v3136_v13  ;;  %3337 = vmatprep.mubr.f32.mxu1 %v3138_v49 }
 0x419   :  { %3268 = vmatmul.mubr.f32.vlgmr.msra.gmra.mrb[4].mxu0 %v3135_v63  ;;  %3338 = vmatmul.mubr.f32.vlgmr.msra.gmra.mrb[4].mxu1 %v3137_v10 }
 0x4ec   :  { %v3496_v17 = vpop.f32.mrb[4].mxu0  ;;  %v3531_v20 = vpop.f32.mrb[4].mxu1 }
 0x4ed   :  { %v3497_v56 = vpop.f32.mrb[5].mxu0  ;;  %v3532_v57 = vpop.f32.mrb[5].mxu1 }
 0x4ee   :  { %v3498_v60 = vadd.f32 %v3497_v56, %v3496_v17  ;;  %v3533_v22 = vadd.f32 %v3532_v57, %v3531_v20 }
 0x4f0   :  { %v3340_v4 = vadd.f32 %v3533_v22, %v3498_v60 }
 0x4f2   :  { %3343 = vst [vmem:[%s4717_s4] sm:$0xff] %v3340_v4 }

</bundles_post_ra>
